<compile_context>
chip_gen: v5e
topology: v5e:2x2
jax: 0.10.0
libtpu: 0.0.40
codegen_flags: <defaults>
</compile_context>

<pallas_src>
import math

import jax
import jax.numpy as jnp
from jax.experimental import pallas as pl
from jax.experimental.pallas import tpu as pltpu

D_MODEL = 32
D_FF = 4 * D_MODEL
N_HEADS = 4
D_HEAD = D_MODEL // N_HEADS
EPS = 1e-5


def _full_spec(shape):
    """BlockSpec that maps the whole (un-batched) parameter array every grid step."""
    return pl.BlockSpec(shape, lambda b, n=len(shape): (0,) * n)


# ----------------------------------------------------------------------------
# Fused kernel: one batch element per grid step, all stages in-register.
# ----------------------------------------------------------------------------
def _decoder_layer_kernel(
        x_ref, cross_ref,
        # self-attention params
        s_wq, s_bq, s_wk, s_bk, s_wv, s_bv, s_wo, s_bo,
        # cross-attention params
        c_wq, c_bq, c_wk, c_bk, c_wv, c_bv, c_wo, c_bo,
        # FFN (conv1/conv2 with kernel_size=1)
        w1_ref, bf1_ref, w2_ref, bf2_ref,
        # LayerNorm affine params
        g1_ref, b1_ref, g2_ref, b2_ref, g3_ref, b3_ref,
        o_ref):

    def attention(xq, xkv, wq_r, bq_r, wk_r, bk_r, wv_r, bv_r, wo_r, bo_r):
        q = jnp.dot(xq, wq_r[...], preferred_element_type=jnp.float32) + bq_r[...]
        k = jnp.dot(xkv, wk_r[...], preferred_element_type=jnp.float32) + bk_r[...]
        v = jnp.dot(xkv, wv_r[...], preferred_element_type=jnp.float32) + bv_r[...]
        wo = wo_r[...]
        scale = 1.0 / math.sqrt(D_HEAD)
        out = None
        for h in range(N_HEADS):                      # static loop over heads
            sl = slice(h * D_HEAD, (h + 1) * D_HEAD)
            qh, kh, vh = q[:, sl], k[:, sl], v[:, sl]
            # q @ k^T without materializing a transpose (contracting dim 1 of both)
            s = jax.lax.dot_general(
                qh, kh, (((1,), (1,)), ((), ())),
                preferred_element_type=jnp.float32) * scale
            s = s - jnp.max(s, axis=-1, keepdims=True)
            p = jnp.exp(s)
            inv = pl.reciprocal(jnp.sum(p, axis=-1, keepdims=True), approx=True)
            ctx = jnp.dot(p, vh, preferred_element_type=jnp.float32) * inv
            # fold the per-head output straight into the output projection
            proj = jnp.dot(ctx, wo[sl, :], preferred_element_type=jnp.float32)
            out = proj if out is None else out + proj
        return out + bo_r[...]

    def add_norm(x, y, g_r, b_r):
        z = x + y
        mu = jnp.mean(z, axis=-1, keepdims=True)
        var = jnp.mean(jnp.square(z - mu), axis=-1, keepdims=True)
        return (z - mu) * jax.lax.rsqrt(var + EPS) * g_r[...] + b_r[...]

    x = x_ref[0].astype(jnp.float32)                  # (L, D)
    cr = cross_ref[0].astype(jnp.float32)             # (S, D)

    # x = LN1(x + SelfAttn(x, x, x))
    x = add_norm(x, attention(x, x, s_wq, s_bq, s_wk, s_bk, s_wv, s_bv, s_wo, s_bo),
                 g1_ref, b1_ref)
    # x = LN2(x + CrossAttn(x, cross, cross))
    x = add_norm(x, attention(x, cr, c_wq, c_bq, c_wk, c_bk, c_wv, c_bv, c_wo, c_bo),
                 g2_ref, b2_ref)
    # y = conv2(relu(conv1(x)));  out = LN3(x + y)
    h = jnp.maximum(
        jnp.dot(x, w1_ref[...], preferred_element_type=jnp.float32) + bf1_ref[...], 0.0)
    y = jnp.dot(h, w2_ref[...], preferred_element_type=jnp.float32) + bf2_ref[...]
    o_ref[0] = add_norm(x, y, g3_ref, b3_ref).astype(o_ref.dtype)


# ----------------------------------------------------------------------------
# Pallas wrapper (single fused call)
# ----------------------------------------------------------------------------
def decoder_layer_pallas(x, cross, params):
    B, L, D = x.shape
    S = cross.shape[1]
    sa, ca = params["self_attn"], params["cross_attn"]
    flat_params = [
        sa["wq"], sa["bq"], sa["wk"], sa["bk"], sa["wv"], sa["bv"], sa["wo"], sa["bo"],
        ca["wq"], ca["bq"], ca["wk"], ca["bk"], ca["wv"], ca["bv"], ca["wo"], ca["bo"],
        params["w1"], params["bf1"], params["w2"], params["bf2"],
        params["g1"], params["b1"], params["g2"], params["b2"],
        params["g3"], params["b3"],
    ]
    return pl.pallas_call(
        _decoder_layer_kernel,
        out_shape=jax.ShapeDtypeStruct((B, L, D), x.dtype),
        grid=(B,),
        in_specs=[pl.BlockSpec((1, L, D), lambda b: (b, 0, 0)),
                  pl.BlockSpec((1, S, D), lambda b: (b, 0, 0))]
                 + [_full_spec(w.shape) for w in flat_params],
        out_specs=pl.BlockSpec((1, L, D), lambda b: (b, 0, 0)),
        compiler_params=pltpu.CompilerParams(dimension_semantics=("parallel",)),
    )(x, cross, *flat_params)


# ----------------------------------------------------------------------------
# Pure-JAX reference (same math, same parameter layout) for verification
# ----------------------------------------------------------------------------
def _mha_ref(xq, xkv, p):
    q = xq @ p["wq"] + p["bq"]
    k = xkv @ p["wk"] + p["bk"]
    v = xkv @ p["wv"] + p["bv"]
    B, L, D = q.shape
    S = k.shape[1]
    qh = q.reshape(B, L, N_HEADS, D_HEAD)
    kh = k.reshape(B, S, N_HEADS, D_HEAD)
    vh = v.reshape(B, S, N_HEADS, D_HEAD)
    s = jnp.einsum("blhd,bshd->bhls", qh, kh) / math.sqrt(D_HEAD)
    p_attn = jax.nn.softmax(s, axis=-1)
    ctx = jnp.einsum("bhls,bshd->blhd", p_attn, vh).reshape(B, L, D)
    return ctx @ p["wo"] + p["bo"]


def _ln_ref(z, g, b):
    mu = jnp.mean(z, axis=-1, keepdims=True)
    var = jnp.mean(jnp.square(z - mu), axis=-1, keepdims=True)
    return (z - mu) * jax.lax.rsqrt(var + EPS) * g + b


def decoder_layer_ref(x, cross, params):
    x = _ln_ref(x + _mha_ref(x, x, params["self_attn"]), params["g1"], params["b1"])
    x = _ln_ref(x + _mha_ref(x, cross, params["cross_attn"]), params["g2"], params["b2"])
    y = jnp.maximum(x @ params["w1"] + params["bf1"], 0.0) @ params["w2"] + params["bf2"]
    return _ln_ref(x + y, params["g3"], params["b3"])


# ----------------------------------------------------------------------------
# Deterministic parameter init
# ----------------------------------------------------------------------------
def init_params(key):
    ks = jax.random.split(key, 12)

    def attn_params(k4):
        ka, kb, kc, kd = jax.random.split(k4, 4)
        mk = lambda k: (0.05 * jax.random.normal(k, (D_MODEL, D_MODEL), jnp.float32))
        return {"wq": mk(ka), "bq": jnp.zeros((1, D_MODEL), jnp.float32),
                "wk": mk(kb), "bk": jnp.zeros((1, D_MODEL), jnp.float32),
                "wv": mk(kc), "bv": jnp.zeros((1, D_MODEL), jnp.float32),
                "wo": mk(kd), "bo": jnp.zeros((1, D_MODEL), jnp.float32)}

    return {
        "self_attn": attn_params(ks[0]),
        "cross_attn": attn_params(ks[1]),
        # conv1: Conv1d(d_model -> d_ff, k=1); conv2: Conv1d(d_ff -> d_model, k=1)
        "w1": 0.05 * jax.random.normal(ks[2], (D_MODEL, D_FF), jnp.float32),
        "bf1": 0.01 * jax.random.normal(ks[3], (1, D_FF), jnp.float32),
        "w2": 0.05 * jax.random.normal(ks[4], (D_FF, D_MODEL), jnp.float32),
        "bf2": 0.01 * jax.random.normal(ks[5], (1, D_MODEL), jnp.float32),
        # LayerNorm affine params (PyTorch init: gamma=1, beta=0)
        "g1": jnp.ones((1, D_MODEL), jnp.float32), "b1": jnp.zeros((1, D_MODEL), jnp.float32),
        "g2": jnp.ones((1, D_MODEL), jnp.float32), "b2": jnp.zeros((1, D_MODEL), jnp.float32),
        "g3": jnp.ones((1, D_MODEL), jnp.float32), "b3": jnp.zeros((1, D_MODEL), jnp.float32),
    }


if __name__ == "__main__":
    key = jax.random.PRNGKey(0)
    k_x, k_c, k_p = jax.random.split(key, 3)

    B, L, S = 2, 8, 16
    x = jax.random.normal(k_x, (B, L, D_MODEL), jnp.float32)
    cross = jax.random.normal(k_c, (B, S, D_MODEL), jnp.float32)
    params = init_params(k_p)

    out = jax.block_until_ready(decoder_layer_pallas(x, cross, params))
    ref = jax.block_until_ready(decoder_layer_ref(x, cross, params))

    assert out.shape == (B, L, D_MODEL)
    # Slightly relaxed tolerance: kernel uses the EUP approximate reciprocal for
    # the softmax normalization (per perf review); any real bug would be >> 1e-2.
    assert jnp.allclose(out, ref, atol=3e-3, rtol=3e-3), (
        f"max abs err = {jnp.max(jnp.abs(out - ref))}")
    print("KERNEL_OK")
</pallas_src>

<mosaic_0001>
module attributes {stable_mosaic.version = 11 : i64} {
  func.func @_decoder_layer_kernel(%arg0: i32, %arg1: memref<1x8x32xf32, #tpu.memory_space<vmem>>, %arg2: memref<1x16x32xf32, #tpu.memory_space<vmem>>, %arg3: memref<32x32xf32, #tpu.memory_space<vmem>>, %arg4: memref<1x32xf32, #tpu.memory_space<vmem>>, %arg5: memref<32x32xf32, #tpu.memory_space<vmem>>, %arg6: memref<1x32xf32, #tpu.memory_space<vmem>>, %arg7: memref<32x32xf32, #tpu.memory_space<vmem>>, %arg8: memref<1x32xf32, #tpu.memory_space<vmem>>, %arg9: memref<32x32xf32, #tpu.memory_space<vmem>>, %arg10: memref<1x32xf32, #tpu.memory_space<vmem>>, %arg11: memref<32x32xf32, #tpu.memory_space<vmem>>, %arg12: memref<1x32xf32, #tpu.memory_space<vmem>>, %arg13: memref<32x32xf32, #tpu.memory_space<vmem>>, %arg14: memref<1x32xf32, #tpu.memory_space<vmem>>, %arg15: memref<32x32xf32, #tpu.memory_space<vmem>>, %arg16: memref<1x32xf32, #tpu.memory_space<vmem>>, %arg17: memref<32x32xf32, #tpu.memory_space<vmem>>, %arg18: memref<1x32xf32, #tpu.memory_space<vmem>>, %arg19: memref<32x128xf32, #tpu.memory_space<vmem>>, %arg20: memref<1x128xf32, #tpu.memory_space<vmem>>, %arg21: memref<128x32xf32, #tpu.memory_space<vmem>>, %arg22: memref<1x32xf32, #tpu.memory_space<vmem>>, %arg23: memref<1x32xf32, #tpu.memory_space<vmem>>, %arg24: memref<1x32xf32, #tpu.memory_space<vmem>>, %arg25: memref<1x32xf32, #tpu.memory_space<vmem>>, %arg26: memref<1x32xf32, #tpu.memory_space<vmem>>, %arg27: memref<1x32xf32, #tpu.memory_space<vmem>>, %arg28: memref<1x32xf32, #tpu.memory_space<vmem>>, %arg29: memref<1x8x32xf32, #tpu.memory_space<vmem>>) attributes {dimension_semantics = [#tpu.dimension_semantics<parallel>], iteration_bounds = array<i64: 2>, scalar_prefetch = 0 : i64, scratch_operands = 0 : i64, tpu.core_type = #tpu.core_type<tc>, window_params = [{transform_indices = @transform_0, window_bounds = array<i64: 1, 8, 32>}, {transform_indices = @transform_1, window_bounds = array<i64: 1, 16, 32>}, {pipeline_mode = #tpu.pipeline_mode<synchronous>, transform_indices = @transform_2, window_bounds = array<i64: 32, 32>}, {pipeline_mode = #tpu.pipeline_mode<synchronous>, transform_indices = @transform_3, window_bounds = array<i64: 1, 32>}, {pipeline_mode = #tpu.pipeline_mode<synchronous>, transform_indices = @transform_4, window_bounds = array<i64: 32, 32>}, {pipeline_mode = #tpu.pipeline_mode<synchronous>, transform_indices = @transform_5, window_bounds = array<i64: 1, 32>}, {pipeline_mode = #tpu.pipeline_mode<synchronous>, transform_indices = @transform_6, window_bounds = array<i64: 32, 32>}, {pipeline_mode = #tpu.pipeline_mode<synchronous>, transform_indices = @transform_7, window_bounds = array<i64: 1, 32>}, {pipeline_mode = #tpu.pipeline_mode<synchronous>, transform_indices = @transform_8, window_bounds = array<i64: 32, 32>}, {pipeline_mode = #tpu.pipeline_mode<synchronous>, transform_indices = @transform_9, window_bounds = array<i64: 1, 32>}, {pipeline_mode = #tpu.pipeline_mode<synchronous>, transform_indices = @transform_10, window_bounds = array<i64: 32, 32>}, {pipeline_mode = #tpu.pipeline_mode<synchronous>, transform_indices = @transform_11, window_bounds = array<i64: 1, 32>}, {pipeline_mode = #tpu.pipeline_mode<synchronous>, transform_indices = @transform_12, window_bounds = array<i64: 32, 32>}, {pipeline_mode = #tpu.pipeline_mode<synchronous>, transform_indices = @transform_13, window_bounds = array<i64: 1, 32>}, {pipeline_mode = #tpu.pipeline_mode<synchronous>, transform_indices = @transform_14, window_bounds = array<i64: 32, 32>}, {pipeline_mode = #tpu.pipeline_mode<synchronous>, transform_indices = @transform_15, window_bounds = array<i64: 1, 32>}, {pipeline_mode = #tpu.pipeline_mode<synchronous>, transform_indices = @transform_16, window_bounds = array<i64: 32, 32>}, {pipeline_mode = #tpu.pipeline_mode<synchronous>, transform_indices = @transform_17, window_bounds = array<i64: 1, 32>}, {pipeline_mode = #tpu.pipeline_mode<synchronous>, transform_indices = @transform_18, window_bounds = array<i64: 32, 128>}, {pipeline_mode = #tpu.pipeline_mode<synchronous>, transform_indices = @transform_19, window_bounds = array<i64: 1, 128>}, {pipeline_mode = #tpu.pipeline_mode<synchronous>, transform_indices = @transform_20, window_bounds = array<i64: 128, 32>}, {pipeline_mode = #tpu.pipeline_mode<synchronous>, transform_indices = @transform_21, window_bounds = array<i64: 1, 32>}, {pipeline_mode = #tpu.pipeline_mode<synchronous>, transform_indices = @transform_22, window_bounds = array<i64: 1, 32>}, {pipeline_mode = #tpu.pipeline_mode<synchronous>, transform_indices = @transform_23, window_bounds = array<i64: 1, 32>}, {pipeline_mode = #tpu.pipeline_mode<synchronous>, transform_indices = @transform_24, window_bounds = array<i64: 1, 32>}, {pipeline_mode = #tpu.pipeline_mode<synchronous>, transform_indices = @transform_25, window_bounds = array<i64: 1, 32>}, {pipeline_mode = #tpu.pipeline_mode<synchronous>, transform_indices = @transform_26, window_bounds = array<i64: 1, 32>}, {pipeline_mode = #tpu.pipeline_mode<synchronous>, transform_indices = @transform_27, window_bounds = array<i64: 1, 32>}, {transform_indices = @transform_28, window_bounds = array<i64: 1, 8, 32>}]} {
    %c0 = arith.constant 0 : index
    %c0_0 = arith.constant 0 : index
    %c0_1 = arith.constant 0 : index
    %0 = vector.load %arg1[%c0, %c0_0, %c0_1] : memref<1x8x32xf32, #tpu.memory_space<vmem>>, vector<1x8x32xf32>
    %1 = vector.shape_cast %0 : vector<1x8x32xf32> to vector<8x32xf32>
    %c0_2 = arith.constant 0 : index
    %c0_3 = arith.constant 0 : index
    %c0_4 = arith.constant 0 : index
    %2 = vector.load %arg2[%c0_2, %c0_3, %c0_4] : memref<1x16x32xf32, #tpu.memory_space<vmem>>, vector<1x16x32xf32>
    %3 = vector.shape_cast %2 : vector<1x16x32xf32> to vector<16x32xf32>
    %c0_5 = arith.constant 0 : index
    %c0_6 = arith.constant 0 : index
    %4 = vector.load %arg3[%c0_5, %c0_6] : memref<32x32xf32, #tpu.memory_space<vmem>>, vector<32x32xf32>
    %cst = arith.constant dense<0.000000e+00> : vector<8x32xf32>
    %5 = tpu.matmul %1, %4, %cst {dimension_numbers = #tpu.dot_dimension_numbers<[1], [0], [0], [1], [0, 0, 1, 1], [], []>} : vector<8x32xf32>, vector<32x32xf32>, vector<8x32xf32> -> vector<8x32xf32>
    %c0_7 = arith.constant 0 : index
    %c0_8 = arith.constant 0 : index
    %6 = vector.load %arg4[%c0_7, %c0_8] : memref<1x32xf32, #tpu.memory_space<vmem>>, vector<1x32xf32>
    %7 = vector.broadcast %6 : vector<1x32xf32> to vector<8x32xf32>
    %8 = arith.addf %5, %7 : vector<8x32xf32>
    %c0_9 = arith.constant 0 : index
    %c0_10 = arith.constant 0 : index
    %9 = vector.load %arg5[%c0_9, %c0_10] : memref<32x32xf32, #tpu.memory_space<vmem>>, vector<32x32xf32>
    %cst_11 = arith.constant dense<0.000000e+00> : vector<8x32xf32>
    %10 = tpu.matmul %1, %9, %cst_11 {dimension_numbers = #tpu.dot_dimension_numbers<[1], [0], [0], [1], [0, 0, 1, 1], [], []>} : vector<8x32xf32>, vector<32x32xf32>, vector<8x32xf32> -> vector<8x32xf32>
    %c0_12 = arith.constant 0 : index
    %c0_13 = arith.constant 0 : index
    %11 = vector.load %arg6[%c0_12, %c0_13] : memref<1x32xf32, #tpu.memory_space<vmem>>, vector<1x32xf32>
    %12 = vector.broadcast %11 : vector<1x32xf32> to vector<8x32xf32>
    %13 = arith.addf %10, %12 : vector<8x32xf32>
    %c0_14 = arith.constant 0 : index
    %c0_15 = arith.constant 0 : index
    %14 = vector.load %arg7[%c0_14, %c0_15] : memref<32x32xf32, #tpu.memory_space<vmem>>, vector<32x32xf32>
    %cst_16 = arith.constant dense<0.000000e+00> : vector<8x32xf32>
    %15 = tpu.matmul %1, %14, %cst_16 {dimension_numbers = #tpu.dot_dimension_numbers<[1], [0], [0], [1], [0, 0, 1, 1], [], []>} : vector<8x32xf32>, vector<32x32xf32>, vector<8x32xf32> -> vector<8x32xf32>
    %c0_17 = arith.constant 0 : index
    %c0_18 = arith.constant 0 : index
    %16 = vector.load %arg8[%c0_17, %c0_18] : memref<1x32xf32, #tpu.memory_space<vmem>>, vector<1x32xf32>
    %17 = vector.broadcast %16 : vector<1x32xf32> to vector<8x32xf32>
    %18 = arith.addf %15, %17 : vector<8x32xf32>
    %c0_19 = arith.constant 0 : index
    %c0_20 = arith.constant 0 : index
    %19 = vector.load %arg9[%c0_19, %c0_20] : memref<32x32xf32, #tpu.memory_space<vmem>>, vector<32x32xf32>
    %20 = vector.extract_strided_slice %8 {offsets = [0, 0], sizes = [8, 8], strides = [1, 1]} : vector<8x32xf32> to vector<8x8xf32>
    %21 = vector.extract_strided_slice %13 {offsets = [0, 0], sizes = [8, 8], strides = [1, 1]} : vector<8x32xf32> to vector<8x8xf32>
    %22 = vector.extract_strided_slice %18 {offsets = [0, 0], sizes = [8, 8], strides = [1, 1]} : vector<8x32xf32> to vector<8x8xf32>
    %cst_21 = arith.constant dense<0.000000e+00> : vector<8x8xf32>
    %23 = tpu.matmul %20, %21, %cst_21 {dimension_numbers = #tpu.dot_dimension_numbers<[1], [1], [0], [0], [0, 0, 1, 0], [], []>} : vector<8x8xf32>, vector<8x8xf32>, vector<8x8xf32> -> vector<8x8xf32>
    %cst_22 = arith.constant 0.353553385 : f32
    %24 = vector.broadcast %cst_22 : f32 to vector<8x8xf32>
    %25 = arith.mulf %23, %24 : vector<8x8xf32>
    %cst_23 = arith.constant dense<0xFF800000> : vector<8xf32>
    %26 = vector.multi_reduction <maximumf>, %25, %cst_23 [1] : vector<8x8xf32> to vector<8xf32>
    %27 = vector.shape_cast %26 : vector<8xf32> to vector<8x1xf32>
    %28 = vector.broadcast %27 : vector<8x1xf32> to vector<8x8xf32>
    %29 = arith.subf %25, %28 : vector<8x8xf32>
    %30 = math.exp %29 : vector<8x8xf32>
    %cst_24 = arith.constant dense<0.000000e+00> : vector<8xf32>
    %31 = vector.multi_reduction <add>, %30, %cst_24 [1] : vector<8x8xf32> to vector<8xf32>
    %32 = vector.shape_cast %31 : vector<8xf32> to vector<8x1xf32>
    %33 = tpu.reciprocal %32 {approx = true} : vector<8x1xf32> -> vector<8x1xf32>
    %cst_25 = arith.constant dense<0.000000e+00> : vector<8x8xf32>
    %34 = tpu.matmul %30, %22, %cst_25 {dimension_numbers = #tpu.dot_dimension_numbers<[1], [0], [0], [1], [0, 0, 1, 1], [], []>} : vector<8x8xf32>, vector<8x8xf32>, vector<8x8xf32> -> vector<8x8xf32>
    %35 = vector.broadcast %33 : vector<8x1xf32> to vector<8x8xf32>
    %36 = arith.mulf %34, %35 : vector<8x8xf32>
    %37 = vector.extract_strided_slice %19 {offsets = [0, 0], sizes = [8, 32], strides = [1, 1]} : vector<32x32xf32> to vector<8x32xf32>
    %cst_26 = arith.constant dense<0.000000e+00> : vector<8x32xf32>
    %38 = tpu.matmul %36, %37, %cst_26 {dimension_numbers = #tpu.dot_dimension_numbers<[1], [0], [0], [1], [0, 0, 1, 1], [], []>} : vector<8x8xf32>, vector<8x32xf32>, vector<8x32xf32> -> vector<8x32xf32>
    %39 = vector.extract_strided_slice %8 {offsets = [0, 8], sizes = [8, 8], strides = [1, 1]} : vector<8x32xf32> to vector<8x8xf32>
    %40 = vector.extract_strided_slice %13 {offsets = [0, 8], sizes = [8, 8], strides = [1, 1]} : vector<8x32xf32> to vector<8x8xf32>
    %41 = vector.extract_strided_slice %18 {offsets = [0, 8], sizes = [8, 8], strides = [1, 1]} : vector<8x32xf32> to vector<8x8xf32>
    %cst_27 = arith.constant dense<0.000000e+00> : vector<8x8xf32>
    %42 = tpu.matmul %39, %40, %cst_27 {dimension_numbers = #tpu.dot_dimension_numbers<[1], [1], [0], [0], [0, 0, 1, 0], [], []>} : vector<8x8xf32>, vector<8x8xf32>, vector<8x8xf32> -> vector<8x8xf32>
    %cst_28 = arith.constant 0.353553385 : f32
    %43 = vector.broadcast %cst_28 : f32 to vector<8x8xf32>
    %44 = arith.mulf %42, %43 : vector<8x8xf32>
    %cst_29 = arith.constant dense<0xFF800000> : vector<8xf32>
    %45 = vector.multi_reduction <maximumf>, %44, %cst_29 [1] : vector<8x8xf32> to vector<8xf32>
    %46 = vector.shape_cast %45 : vector<8xf32> to vector<8x1xf32>
    %47 = vector.broadcast %46 : vector<8x1xf32> to vector<8x8xf32>
    %48 = arith.subf %44, %47 : vector<8x8xf32>
    %49 = math.exp %48 : vector<8x8xf32>
    %cst_30 = arith.constant dense<0.000000e+00> : vector<8xf32>
    %50 = vector.multi_reduction <add>, %49, %cst_30 [1] : vector<8x8xf32> to vector<8xf32>
    %51 = vector.shape_cast %50 : vector<8xf32> to vector<8x1xf32>
    %52 = tpu.reciprocal %51 {approx = true} : vector<8x1xf32> -> vector<8x1xf32>
    %cst_31 = arith.constant dense<0.000000e+00> : vector<8x8xf32>
    %53 = tpu.matmul %49, %41, %cst_31 {dimension_numbers = #tpu.dot_dimension_numbers<[1], [0], [0], [1], [0, 0, 1, 1], [], []>} : vector<8x8xf32>, vector<8x8xf32>, vector<8x8xf32> -> vector<8x8xf32>
    %54 = vector.broadcast %52 : vector<8x1xf32> to vector<8x8xf32>
    %55 = arith.mulf %53, %54 : vector<8x8xf32>
    %56 = vector.extract_strided_slice %19 {offsets = [8, 0], sizes = [8, 32], strides = [1, 1]} : vector<32x32xf32> to vector<8x32xf32>
    %cst_32 = arith.constant dense<0.000000e+00> : vector<8x32xf32>
    %57 = tpu.matmul %55, %56, %cst_32 {dimension_numbers = #tpu.dot_dimension_numbers<[1], [0], [0], [1], [0, 0, 1, 1], [], []>} : vector<8x8xf32>, vector<8x32xf32>, vector<8x32xf32> -> vector<8x32xf32>
    %58 = arith.addf %38, %57 : vector<8x32xf32>
    %59 = vector.extract_strided_slice %8 {offsets = [0, 16], sizes = [8, 8], strides = [1, 1]} : vector<8x32xf32> to vector<8x8xf32>
    %60 = vector.extract_strided_slice %13 {offsets = [0, 16], sizes = [8, 8], strides = [1, 1]} : vector<8x32xf32> to vector<8x8xf32>
    %61 = vector.extract_strided_slice %18 {offsets = [0, 16], sizes = [8, 8], strides = [1, 1]} : vector<8x32xf32> to vector<8x8xf32>
    %cst_33 = arith.constant dense<0.000000e+00> : vector<8x8xf32>
    %62 = tpu.matmul %59, %60, %cst_33 {dimension_numbers = #tpu.dot_dimension_numbers<[1], [1], [0], [0], [0, 0, 1, 0], [], []>} : vector<8x8xf32>, vector<8x8xf32>, vector<8x8xf32> -> vector<8x8xf32>
    %cst_34 = arith.constant 0.353553385 : f32
    %63 = vector.broadcast %cst_34 : f32 to vector<8x8xf32>
    %64 = arith.mulf %62, %63 : vector<8x8xf32>
    %cst_35 = arith.constant dense<0xFF800000> : vector<8xf32>
    %65 = vector.multi_reduction <maximumf>, %64, %cst_35 [1] : vector<8x8xf32> to vector<8xf32>
    %66 = vector.shape_cast %65 : vector<8xf32> to vector<8x1xf32>
    %67 = vector.broadcast %66 : vector<8x1xf32> to vector<8x8xf32>
    %68 = arith.subf %64, %67 : vector<8x8xf32>
    %69 = math.exp %68 : vector<8x8xf32>
    %cst_36 = arith.constant dense<0.000000e+00> : vector<8xf32>
    %70 = vector.multi_reduction <add>, %69, %cst_36 [1] : vector<8x8xf32> to vector<8xf32>
    %71 = vector.shape_cast %70 : vector<8xf32> to vector<8x1xf32>
    %72 = tpu.reciprocal %71 {approx = true} : vector<8x1xf32> -> vector<8x1xf32>
    %cst_37 = arith.constant dense<0.000000e+00> : vector<8x8xf32>
    %73 = tpu.matmul %69, %61, %cst_37 {dimension_numbers = #tpu.dot_dimension_numbers<[1], [0], [0], [1], [0, 0, 1, 1], [], []>} : vector<8x8xf32>, vector<8x8xf32>, vector<8x8xf32> -> vector<8x8xf32>
    %74 = vector.broadcast %72 : vector<8x1xf32> to vector<8x8xf32>
    %75 = arith.mulf %73, %74 : vector<8x8xf32>
    %76 = vector.extract_strided_slice %19 {offsets = [16, 0], sizes = [8, 32], strides = [1, 1]} : vector<32x32xf32> to vector<8x32xf32>
    %cst_38 = arith.constant dense<0.000000e+00> : vector<8x32xf32>
    %77 = tpu.matmul %75, %76, %cst_38 {dimension_numbers = #tpu.dot_dimension_numbers<[1], [0], [0], [1], [0, 0, 1, 1], [], []>} : vector<8x8xf32>, vector<8x32xf32>, vector<8x32xf32> -> vector<8x32xf32>
    %78 = arith.addf %58, %77 : vector<8x32xf32>
    %79 = vector.extract_strided_slice %8 {offsets = [0, 24], sizes = [8, 8], strides = [1, 1]} : vector<8x32xf32> to vector<8x8xf32>
    %80 = vector.extract_strided_slice %13 {offsets = [0, 24], sizes = [8, 8], strides = [1, 1]} : vector<8x32xf32> to vector<8x8xf32>
    %81 = vector.extract_strided_slice %18 {offsets = [0, 24], sizes = [8, 8], strides = [1, 1]} : vector<8x32xf32> to vector<8x8xf32>
    %cst_39 = arith.constant dense<0.000000e+00> : vector<8x8xf32>
    %82 = tpu.matmul %79, %80, %cst_39 {dimension_numbers = #tpu.dot_dimension_numbers<[1], [1], [0], [0], [0, 0, 1, 0], [], []>} : vector<8x8xf32>, vector<8x8xf32>, vector<8x8xf32> -> vector<8x8xf32>
    %cst_40 = arith.constant 0.353553385 : f32
    %83 = vector.broadcast %cst_40 : f32 to vector<8x8xf32>
    %84 = arith.mulf %82, %83 : vector<8x8xf32>
    %cst_41 = arith.constant dense<0xFF800000> : vector<8xf32>
    %85 = vector.multi_reduction <maximumf>, %84, %cst_41 [1] : vector<8x8xf32> to vector<8xf32>
    %86 = vector.shape_cast %85 : vector<8xf32> to vector<8x1xf32>
    %87 = vector.broadcast %86 : vector<8x1xf32> to vector<8x8xf32>
    %88 = arith.subf %84, %87 : vector<8x8xf32>
    %89 = math.exp %88 : vector<8x8xf32>
    %cst_42 = arith.constant dense<0.000000e+00> : vector<8xf32>
    %90 = vector.multi_reduction <add>, %89, %cst_42 [1] : vector<8x8xf32> to vector<8xf32>
    %91 = vector.shape_cast %90 : vector<8xf32> to vector<8x1xf32>
    %92 = tpu.reciprocal %91 {approx = true} : vector<8x1xf32> -> vector<8x1xf32>
    %cst_43 = arith.constant dense<0.000000e+00> : vector<8x8xf32>
    %93 = tpu.matmul %89, %81, %cst_43 {dimension_numbers = #tpu.dot_dimension_numbers<[1], [0], [0], [1], [0, 0, 1, 1], [], []>} : vector<8x8xf32>, vector<8x8xf32>, vector<8x8xf32> -> vector<8x8xf32>
    %94 = vector.broadcast %92 : vector<8x1xf32> to vector<8x8xf32>
    %95 = arith.mulf %93, %94 : vector<8x8xf32>
    %96 = vector.extract_strided_slice %19 {offsets = [24, 0], sizes = [8, 32], strides = [1, 1]} : vector<32x32xf32> to vector<8x32xf32>
    %cst_44 = arith.constant dense<0.000000e+00> : vector<8x32xf32>
    %97 = tpu.matmul %95, %96, %cst_44 {dimension_numbers = #tpu.dot_dimension_numbers<[1], [0], [0], [1], [0, 0, 1, 1], [], []>} : vector<8x8xf32>, vector<8x32xf32>, vector<8x32xf32> -> vector<8x32xf32>
    %98 = arith.addf %78, %97 : vector<8x32xf32>
    %c0_45 = arith.constant 0 : index
    %c0_46 = arith.constant 0 : index
    %99 = vector.load %arg10[%c0_45, %c0_46] : memref<1x32xf32, #tpu.memory_space<vmem>>, vector<1x32xf32>
    %100 = vector.broadcast %99 : vector<1x32xf32> to vector<8x32xf32>
    %101 = arith.addf %98, %100 : vector<8x32xf32>
    %102 = arith.addf %1, %101 : vector<8x32xf32>
    %cst_47 = arith.constant dense<0.000000e+00> : vector<8xf32>
    %103 = vector.multi_reduction <add>, %102, %cst_47 [1] : vector<8x32xf32> to vector<8xf32>
    %104 = vector.shape_cast %103 : vector<8xf32> to vector<8x1xf32>
    %cst_48 = arith.constant 3.200000e+01 : f32
    %105 = vector.broadcast %cst_48 : f32 to vector<8x1xf32>
    %106 = arith.divf %104, %105 : vector<8x1xf32>
    %107 = vector.broadcast %106 : vector<8x1xf32> to vector<8x32xf32>
    %108 = arith.subf %102, %107 : vector<8x32xf32>
    %109 = arith.mulf %108, %108 : vector<8x32xf32>
    %cst_49 = arith.constant dense<0.000000e+00> : vector<8xf32>
    %110 = vector.multi_reduction <add>, %109, %cst_49 [1] : vector<8x32xf32> to vector<8xf32>
    %111 = vector.shape_cast %110 : vector<8xf32> to vector<8x1xf32>
    %cst_50 = arith.constant 3.200000e+01 : f32
    %112 = vector.broadcast %cst_50 : f32 to vector<8x1xf32>
    %113 = arith.divf %111, %112 : vector<8x1xf32>
    %114 = vector.broadcast %106 : vector<8x1xf32> to vector<8x32xf32>
    %115 = arith.subf %102, %114 : vector<8x32xf32>
    %cst_51 = arith.constant 9.99999974E-6 : f32
    %116 = vector.broadcast %cst_51 : f32 to vector<8x1xf32>
    %117 = arith.addf %113, %116 : vector<8x1xf32>
    %118 = math.rsqrt %117 : vector<8x1xf32>
    %119 = vector.broadcast %118 : vector<8x1xf32> to vector<8x32xf32>
    %120 = arith.mulf %115, %119 : vector<8x32xf32>
    %c0_52 = arith.constant 0 : index
    %c0_53 = arith.constant 0 : index
    %121 = vector.load %arg23[%c0_52, %c0_53] : memref<1x32xf32, #tpu.memory_space<vmem>>, vector<1x32xf32>
    %122 = vector.broadcast %121 : vector<1x32xf32> to vector<8x32xf32>
    %123 = arith.mulf %120, %122 : vector<8x32xf32>
    %c0_54 = arith.constant 0 : index
    %c0_55 = arith.constant 0 : index
    %124 = vector.load %arg24[%c0_54, %c0_55] : memref<1x32xf32, #tpu.memory_space<vmem>>, vector<1x32xf32>
    %125 = vector.broadcast %124 : vector<1x32xf32> to vector<8x32xf32>
    %126 = arith.addf %123, %125 : vector<8x32xf32>
    %c0_56 = arith.constant 0 : index
    %c0_57 = arith.constant 0 : index
    %127 = vector.load %arg11[%c0_56, %c0_57] : memref<32x32xf32, #tpu.memory_space<vmem>>, vector<32x32xf32>
    %cst_58 = arith.constant dense<0.000000e+00> : vector<8x32xf32>
    %128 = tpu.matmul %126, %127, %cst_58 {dimension_numbers = #tpu.dot_dimension_numbers<[1], [0], [0], [1], [0, 0, 1, 1], [], []>} : vector<8x32xf32>, vector<32x32xf32>, vector<8x32xf32> -> vector<8x32xf32>
    %c0_59 = arith.constant 0 : index
    %c0_60 = arith.constant 0 : index
    %129 = vector.load %arg12[%c0_59, %c0_60] : memref<1x32xf32, #tpu.memory_space<vmem>>, vector<1x32xf32>
    %130 = vector.broadcast %129 : vector<1x32xf32> to vector<8x32xf32>
    %131 = arith.addf %128, %130 : vector<8x32xf32>
    %c0_61 = arith.constant 0 : index
    %c0_62 = arith.constant 0 : index
    %132 = vector.load %arg13[%c0_61, %c0_62] : memref<32x32xf32, #tpu.memory_space<vmem>>, vector<32x32xf32>
    %cst_63 = arith.constant dense<0.000000e+00> : vector<16x32xf32>
    %133 = tpu.matmul %3, %132, %cst_63 {dimension_numbers = #tpu.dot_dimension_numbers<[1], [0], [0], [1], [0, 0, 1, 1], [], []>} : vector<16x32xf32>, vector<32x32xf32>, vector<16x32xf32> -> vector<16x32xf32>
    %c0_64 = arith.constant 0 : index
    %c0_65 = arith.constant 0 : index
    %134 = vector.load %arg14[%c0_64, %c0_65] : memref<1x32xf32, #tpu.memory_space<vmem>>, vector<1x32xf32>
    %135 = vector.broadcast %134 : vector<1x32xf32> to vector<16x32xf32>
    %136 = arith.addf %133, %135 : vector<16x32xf32>
    %c0_66 = arith.constant 0 : index
    %c0_67 = arith.constant 0 : index
    %137 = vector.load %arg15[%c0_66, %c0_67] : memref<32x32xf32, #tpu.memory_space<vmem>>, vector<32x32xf32>
    %cst_68 = arith.constant dense<0.000000e+00> : vector<16x32xf32>
    %138 = tpu.matmul %3, %137, %cst_68 {dimension_numbers = #tpu.dot_dimension_numbers<[1], [0], [0], [1], [0, 0, 1, 1], [], []>} : vector<16x32xf32>, vector<32x32xf32>, vector<16x32xf32> -> vector<16x32xf32>
    %c0_69 = arith.constant 0 : index
    %c0_70 = arith.constant 0 : index
    %139 = vector.load %arg16[%c0_69, %c0_70] : memref<1x32xf32, #tpu.memory_space<vmem>>, vector<1x32xf32>
    %140 = vector.broadcast %139 : vector<1x32xf32> to vector<16x32xf32>
    %141 = arith.addf %138, %140 : vector<16x32xf32>
    %c0_71 = arith.constant 0 : index
    %c0_72 = arith.constant 0 : index
    %142 = vector.load %arg17[%c0_71, %c0_72] : memref<32x32xf32, #tpu.memory_space<vmem>>, vector<32x32xf32>
    %143 = vector.extract_strided_slice %131 {offsets = [0, 0], sizes = [8, 8], strides = [1, 1]} : vector<8x32xf32> to vector<8x8xf32>
    %144 = vector.extract_strided_slice %136 {offsets = [0, 0], sizes = [16, 8], strides = [1, 1]} : vector<16x32xf32> to vector<16x8xf32>
    %145 = vector.extract_strided_slice %141 {offsets = [0, 0], sizes = [16, 8], strides = [1, 1]} : vector<16x32xf32> to vector<16x8xf32>
    %cst_73 = arith.constant dense<0.000000e+00> : vector<8x16xf32>
    %146 = tpu.matmul %143, %144, %cst_73 {dimension_numbers = #tpu.dot_dimension_numbers<[1], [1], [0], [0], [0, 0, 1, 0], [], []>} : vector<8x8xf32>, vector<16x8xf32>, vector<8x16xf32> -> vector<8x16xf32>
    %cst_74 = arith.constant 0.353553385 : f32
    %147 = vector.broadcast %cst_74 : f32 to vector<8x16xf32>
    %148 = arith.mulf %146, %147 : vector<8x16xf32>
    %cst_75 = arith.constant dense<0xFF800000> : vector<8xf32>
    %149 = vector.multi_reduction <maximumf>, %148, %cst_75 [1] : vector<8x16xf32> to vector<8xf32>
    %150 = vector.shape_cast %149 : vector<8xf32> to vector<8x1xf32>
    %151 = vector.broadcast %150 : vector<8x1xf32> to vector<8x16xf32>
    %152 = arith.subf %148, %151 : vector<8x16xf32>
    %153 = math.exp %152 : vector<8x16xf32>
    %cst_76 = arith.constant dense<0.000000e+00> : vector<8xf32>
    %154 = vector.multi_reduction <add>, %153, %cst_76 [1] : vector<8x16xf32> to vector<8xf32>
    %155 = vector.shape_cast %154 : vector<8xf32> to vector<8x1xf32>
    %156 = tpu.reciprocal %155 {approx = true} : vector<8x1xf32> -> vector<8x1xf32>
    %cst_77 = arith.constant dense<0.000000e+00> : vector<8x8xf32>
    %157 = tpu.matmul %153, %145, %cst_77 {dimension_numbers = #tpu.dot_dimension_numbers<[1], [0], [0], [1], [0, 0, 1, 1], [], []>} : vector<8x16xf32>, vector<16x8xf32>, vector<8x8xf32> -> vector<8x8xf32>
    %158 = vector.broadcast %156 : vector<8x1xf32> to vector<8x8xf32>
    %159 = arith.mulf %157, %158 : vector<8x8xf32>
    %160 = vector.extract_strided_slice %142 {offsets = [0, 0], sizes = [8, 32], strides = [1, 1]} : vector<32x32xf32> to vector<8x32xf32>
    %cst_78 = arith.constant dense<0.000000e+00> : vector<8x32xf32>
    %161 = tpu.matmul %159, %160, %cst_78 {dimension_numbers = #tpu.dot_dimension_numbers<[1], [0], [0], [1], [0, 0, 1, 1], [], []>} : vector<8x8xf32>, vector<8x32xf32>, vector<8x32xf32> -> vector<8x32xf32>
    %162 = vector.extract_strided_slice %131 {offsets = [0, 8], sizes = [8, 8], strides = [1, 1]} : vector<8x32xf32> to vector<8x8xf32>
    %163 = vector.extract_strided_slice %136 {offsets = [0, 8], sizes = [16, 8], strides = [1, 1]} : vector<16x32xf32> to vector<16x8xf32>
    %164 = vector.extract_strided_slice %141 {offsets = [0, 8], sizes = [16, 8], strides = [1, 1]} : vector<16x32xf32> to vector<16x8xf32>
    %cst_79 = arith.constant dense<0.000000e+00> : vector<8x16xf32>
    %165 = tpu.matmul %162, %163, %cst_79 {dimension_numbers = #tpu.dot_dimension_numbers<[1], [1], [0], [0], [0, 0, 1, 0], [], []>} : vector<8x8xf32>, vector<16x8xf32>, vector<8x16xf32> -> vector<8x16xf32>
    %cst_80 = arith.constant 0.353553385 : f32
    %166 = vector.broadcast %cst_80 : f32 to vector<8x16xf32>
    %167 = arith.mulf %165, %166 : vector<8x16xf32>
    %cst_81 = arith.constant dense<0xFF800000> : vector<8xf32>
    %168 = vector.multi_reduction <maximumf>, %167, %cst_81 [1] : vector<8x16xf32> to vector<8xf32>
    %169 = vector.shape_cast %168 : vector<8xf32> to vector<8x1xf32>
    %170 = vector.broadcast %169 : vector<8x1xf32> to vector<8x16xf32>
    %171 = arith.subf %167, %170 : vector<8x16xf32>
    %172 = math.exp %171 : vector<8x16xf32>
    %cst_82 = arith.constant dense<0.000000e+00> : vector<8xf32>
    %173 = vector.multi_reduction <add>, %172, %cst_82 [1] : vector<8x16xf32> to vector<8xf32>
    %174 = vector.shape_cast %173 : vector<8xf32> to vector<8x1xf32>
    %175 = tpu.reciprocal %174 {approx = true} : vector<8x1xf32> -> vector<8x1xf32>
    %cst_83 = arith.constant dense<0.000000e+00> : vector<8x8xf32>
    %176 = tpu.matmul %172, %164, %cst_83 {dimension_numbers = #tpu.dot_dimension_numbers<[1], [0], [0], [1], [0, 0, 1, 1], [], []>} : vector<8x16xf32>, vector<16x8xf32>, vector<8x8xf32> -> vector<8x8xf32>
    %177 = vector.broadcast %175 : vector<8x1xf32> to vector<8x8xf32>
    %178 = arith.mulf %176, %177 : vector<8x8xf32>
    %179 = vector.extract_strided_slice %142 {offsets = [8, 0], sizes = [8, 32], strides = [1, 1]} : vector<32x32xf32> to vector<8x32xf32>
    %cst_84 = arith.constant dense<0.000000e+00> : vector<8x32xf32>
    %180 = tpu.matmul %178, %179, %cst_84 {dimension_numbers = #tpu.dot_dimension_numbers<[1], [0], [0], [1], [0, 0, 1, 1], [], []>} : vector<8x8xf32>, vector<8x32xf32>, vector<8x32xf32> -> vector<8x32xf32>
    %181 = arith.addf %161, %180 : vector<8x32xf32>
    %182 = vector.extract_strided_slice %131 {offsets = [0, 16], sizes = [8, 8], strides = [1, 1]} : vector<8x32xf32> to vector<8x8xf32>
    %183 = vector.extract_strided_slice %136 {offsets = [0, 16], sizes = [16, 8], strides = [1, 1]} : vector<16x32xf32> to vector<16x8xf32>
    %184 = vector.extract_strided_slice %141 {offsets = [0, 16], sizes = [16, 8], strides = [1, 1]} : vector<16x32xf32> to vector<16x8xf32>
    %cst_85 = arith.constant dense<0.000000e+00> : vector<8x16xf32>
    %185 = tpu.matmul %182, %183, %cst_85 {dimension_numbers = #tpu.dot_dimension_numbers<[1], [1], [0], [0], [0, 0, 1, 0], [], []>} : vector<8x8xf32>, vector<16x8xf32>, vector<8x16xf32> -> vector<8x16xf32>
    %cst_86 = arith.constant 0.353553385 : f32
    %186 = vector.broadcast %cst_86 : f32 to vector<8x16xf32>
    %187 = arith.mulf %185, %186 : vector<8x16xf32>
    %cst_87 = arith.constant dense<0xFF800000> : vector<8xf32>
    %188 = vector.multi_reduction <maximumf>, %187, %cst_87 [1] : vector<8x16xf32> to vector<8xf32>
    %189 = vector.shape_cast %188 : vector<8xf32> to vector<8x1xf32>
    %190 = vector.broadcast %189 : vector<8x1xf32> to vector<8x16xf32>
    %191 = arith.subf %187, %190 : vector<8x16xf32>
    %192 = math.exp %191 : vector<8x16xf32>
    %cst_88 = arith.constant dense<0.000000e+00> : vector<8xf32>
    %193 = vector.multi_reduction <add>, %192, %cst_88 [1] : vector<8x16xf32> to vector<8xf32>
    %194 = vector.shape_cast %193 : vector<8xf32> to vector<8x1xf32>
    %195 = tpu.reciprocal %194 {approx = true} : vector<8x1xf32> -> vector<8x1xf32>
    %cst_89 = arith.constant dense<0.000000e+00> : vector<8x8xf32>
    %196 = tpu.matmul %192, %184, %cst_89 {dimension_numbers = #tpu.dot_dimension_numbers<[1], [0], [0], [1], [0, 0, 1, 1], [], []>} : vector<8x16xf32>, vector<16x8xf32>, vector<8x8xf32> -> vector<8x8xf32>
    %197 = vector.broadcast %195 : vector<8x1xf32> to vector<8x8xf32>
    %198 = arith.mulf %196, %197 : vector<8x8xf32>
    %199 = vector.extract_strided_slice %142 {offsets = [16, 0], sizes = [8, 32], strides = [1, 1]} : vector<32x32xf32> to vector<8x32xf32>
    %cst_90 = arith.constant dense<0.000000e+00> : vector<8x32xf32>
    %200 = tpu.matmul %198, %199, %cst_90 {dimension_numbers = #tpu.dot_dimension_numbers<[1], [0], [0], [1], [0, 0, 1, 1], [], []>} : vector<8x8xf32>, vector<8x32xf32>, vector<8x32xf32> -> vector<8x32xf32>
    %201 = arith.addf %181, %200 : vector<8x32xf32>
    %202 = vector.extract_strided_slice %131 {offsets = [0, 24], sizes = [8, 8], strides = [1, 1]} : vector<8x32xf32> to vector<8x8xf32>
    %203 = vector.extract_strided_slice %136 {offsets = [0, 24], sizes = [16, 8], strides = [1, 1]} : vector<16x32xf32> to vector<16x8xf32>
    %204 = vector.extract_strided_slice %141 {offsets = [0, 24], sizes = [16, 8], strides = [1, 1]} : vector<16x32xf32> to vector<16x8xf32>
    %cst_91 = arith.constant dense<0.000000e+00> : vector<8x16xf32>
    %205 = tpu.matmul %202, %203, %cst_91 {dimension_numbers = #tpu.dot_dimension_numbers<[1], [1], [0], [0], [0, 0, 1, 0], [], []>} : vector<8x8xf32>, vector<16x8xf32>, vector<8x16xf32> -> vector<8x16xf32>
    %cst_92 = arith.constant 0.353553385 : f32
    %206 = vector.broadcast %cst_92 : f32 to vector<8x16xf32>
    %207 = arith.mulf %205, %206 : vector<8x16xf32>
    %cst_93 = arith.constant dense<0xFF800000> : vector<8xf32>
    %208 = vector.multi_reduction <maximumf>, %207, %cst_93 [1] : vector<8x16xf32> to vector<8xf32>
    %209 = vector.shape_cast %208 : vector<8xf32> to vector<8x1xf32>
    %210 = vector.broadcast %209 : vector<8x1xf32> to vector<8x16xf32>
    %211 = arith.subf %207, %210 : vector<8x16xf32>
    %212 = math.exp %211 : vector<8x16xf32>
    %cst_94 = arith.constant dense<0.000000e+00> : vector<8xf32>
    %213 = vector.multi_reduction <add>, %212, %cst_94 [1] : vector<8x16xf32> to vector<8xf32>
    %214 = vector.shape_cast %213 : vector<8xf32> to vector<8x1xf32>
    %215 = tpu.reciprocal %214 {approx = true} : vector<8x1xf32> -> vector<8x1xf32>
    %cst_95 = arith.constant dense<0.000000e+00> : vector<8x8xf32>
    %216 = tpu.matmul %212, %204, %cst_95 {dimension_numbers = #tpu.dot_dimension_numbers<[1], [0], [0], [1], [0, 0, 1, 1], [], []>} : vector<8x16xf32>, vector<16x8xf32>, vector<8x8xf32> -> vector<8x8xf32>
    %217 = vector.broadcast %215 : vector<8x1xf32> to vector<8x8xf32>
    %218 = arith.mulf %216, %217 : vector<8x8xf32>
    %219 = vector.extract_strided_slice %142 {offsets = [24, 0], sizes = [8, 32], strides = [1, 1]} : vector<32x32xf32> to vector<8x32xf32>
    %cst_96 = arith.constant dense<0.000000e+00> : vector<8x32xf32>
    %220 = tpu.matmul %218, %219, %cst_96 {dimension_numbers = #tpu.dot_dimension_numbers<[1], [0], [0], [1], [0, 0, 1, 1], [], []>} : vector<8x8xf32>, vector<8x32xf32>, vector<8x32xf32> -> vector<8x32xf32>
    %221 = arith.addf %201, %220 : vector<8x32xf32>
    %c0_97 = arith.constant 0 : index
    %c0_98 = arith.constant 0 : index
    %222 = vector.load %arg18[%c0_97, %c0_98] : memref<1x32xf32, #tpu.memory_space<vmem>>, vector<1x32xf32>
    %223 = vector.broadcast %222 : vector<1x32xf32> to vector<8x32xf32>
    %224 = arith.addf %221, %223 : vector<8x32xf32>
    %225 = arith.addf %126, %224 : vector<8x32xf32>
    %cst_99 = arith.constant dense<0.000000e+00> : vector<8xf32>
    %226 = vector.multi_reduction <add>, %225, %cst_99 [1] : vector<8x32xf32> to vector<8xf32>
    %227 = vector.shape_cast %226 : vector<8xf32> to vector<8x1xf32>
    %cst_100 = arith.constant 3.200000e+01 : f32
    %228 = vector.broadcast %cst_100 : f32 to vector<8x1xf32>
    %229 = arith.divf %227, %228 : vector<8x1xf32>
    %230 = vector.broadcast %229 : vector<8x1xf32> to vector<8x32xf32>
    %231 = arith.subf %225, %230 : vector<8x32xf32>
    %232 = arith.mulf %231, %231 : vector<8x32xf32>
    %cst_101 = arith.constant dense<0.000000e+00> : vector<8xf32>
    %233 = vector.multi_reduction <add>, %232, %cst_101 [1] : vector<8x32xf32> to vector<8xf32>
    %234 = vector.shape_cast %233 : vector<8xf32> to vector<8x1xf32>
    %cst_102 = arith.constant 3.200000e+01 : f32
    %235 = vector.broadcast %cst_102 : f32 to vector<8x1xf32>
    %236 = arith.divf %234, %235 : vector<8x1xf32>
    %237 = vector.broadcast %229 : vector<8x1xf32> to vector<8x32xf32>
    %238 = arith.subf %225, %237 : vector<8x32xf32>
    %cst_103 = arith.constant 9.99999974E-6 : f32
    %239 = vector.broadcast %cst_103 : f32 to vector<8x1xf32>
    %240 = arith.addf %236, %239 : vector<8x1xf32>
    %241 = math.rsqrt %240 : vector<8x1xf32>
    %242 = vector.broadcast %241 : vector<8x1xf32> to vector<8x32xf32>
    %243 = arith.mulf %238, %242 : vector<8x32xf32>
    %c0_104 = arith.constant 0 : index
    %c0_105 = arith.constant 0 : index
    %244 = vector.load %arg25[%c0_104, %c0_105] : memref<1x32xf32, #tpu.memory_space<vmem>>, vector<1x32xf32>
    %245 = vector.broadcast %244 : vector<1x32xf32> to vector<8x32xf32>
    %246 = arith.mulf %243, %245 : vector<8x32xf32>
    %c0_106 = arith.constant 0 : index
    %c0_107 = arith.constant 0 : index
    %247 = vector.load %arg26[%c0_106, %c0_107] : memref<1x32xf32, #tpu.memory_space<vmem>>, vector<1x32xf32>
    %248 = vector.broadcast %247 : vector<1x32xf32> to vector<8x32xf32>
    %249 = arith.addf %246, %248 : vector<8x32xf32>
    %c0_108 = arith.constant 0 : index
    %c0_109 = arith.constant 0 : index
    %250 = vector.load %arg19[%c0_108, %c0_109] : memref<32x128xf32, #tpu.memory_space<vmem>>, vector<32x128xf32>
    %cst_110 = arith.constant dense<0.000000e+00> : vector<8x128xf32>
    %251 = tpu.matmul %249, %250, %cst_110 {dimension_numbers = #tpu.dot_dimension_numbers<[1], [0], [0], [1], [0, 0, 1, 1], [], []>} : vector<8x32xf32>, vector<32x128xf32>, vector<8x128xf32> -> vector<8x128xf32>
    %c0_111 = arith.constant 0 : index
    %c0_112 = arith.constant 0 : index
    %252 = vector.load %arg20[%c0_111, %c0_112] : memref<1x128xf32, #tpu.memory_space<vmem>>, vector<1x128xf32>
    %253 = vector.broadcast %252 : vector<1x128xf32> to vector<8x128xf32>
    %254 = arith.addf %251, %253 : vector<8x128xf32>
    %cst_113 = arith.constant 0.000000e+00 : f32
    %255 = vector.broadcast %cst_113 : f32 to vector<8x128xf32>
    %256 = arith.maximumf %254, %255 : vector<8x128xf32>
    %c0_114 = arith.constant 0 : index
    %c0_115 = arith.constant 0 : index
    %257 = vector.load %arg21[%c0_114, %c0_115] : memref<128x32xf32, #tpu.memory_space<vmem>>, vector<128x32xf32>
    %cst_116 = arith.constant dense<0.000000e+00> : vector<8x32xf32>
    %258 = tpu.matmul %256, %257, %cst_116 {dimension_numbers = #tpu.dot_dimension_numbers<[1], [0], [0], [1], [0, 0, 1, 1], [], []>} : vector<8x128xf32>, vector<128x32xf32>, vector<8x32xf32> -> vector<8x32xf32>
    %c0_117 = arith.constant 0 : index
    %c0_118 = arith.constant 0 : index
    %259 = vector.load %arg22[%c0_117, %c0_118] : memref<1x32xf32, #tpu.memory_space<vmem>>, vector<1x32xf32>
    %260 = vector.broadcast %259 : vector<1x32xf32> to vector<8x32xf32>
    %261 = arith.addf %258, %260 : vector<8x32xf32>
    %262 = arith.addf %249, %261 : vector<8x32xf32>
    %cst_119 = arith.constant dense<0.000000e+00> : vector<8xf32>
    %263 = vector.multi_reduction <add>, %262, %cst_119 [1] : vector<8x32xf32> to vector<8xf32>
    %264 = vector.shape_cast %263 : vector<8xf32> to vector<8x1xf32>
    %cst_120 = arith.constant 3.200000e+01 : f32
    %265 = vector.broadcast %cst_120 : f32 to vector<8x1xf32>
    %266 = arith.divf %264, %265 : vector<8x1xf32>
    %267 = vector.broadcast %266 : vector<8x1xf32> to vector<8x32xf32>
    %268 = arith.subf %262, %267 : vector<8x32xf32>
    %269 = arith.mulf %268, %268 : vector<8x32xf32>
    %cst_121 = arith.constant dense<0.000000e+00> : vector<8xf32>
    %270 = vector.multi_reduction <add>, %269, %cst_121 [1] : vector<8x32xf32> to vector<8xf32>
    %271 = vector.shape_cast %270 : vector<8xf32> to vector<8x1xf32>
    %cst_122 = arith.constant 3.200000e+01 : f32
    %272 = vector.broadcast %cst_122 : f32 to vector<8x1xf32>
    %273 = arith.divf %271, %272 : vector<8x1xf32>
    %274 = vector.broadcast %266 : vector<8x1xf32> to vector<8x32xf32>
    %275 = arith.subf %262, %274 : vector<8x32xf32>
    %cst_123 = arith.constant 9.99999974E-6 : f32
    %276 = vector.broadcast %cst_123 : f32 to vector<8x1xf32>
    %277 = arith.addf %273, %276 : vector<8x1xf32>
    %278 = math.rsqrt %277 : vector<8x1xf32>
    %279 = vector.broadcast %278 : vector<8x1xf32> to vector<8x32xf32>
    %280 = arith.mulf %275, %279 : vector<8x32xf32>
    %c0_124 = arith.constant 0 : index
    %c0_125 = arith.constant 0 : index
    %281 = vector.load %arg27[%c0_124, %c0_125] : memref<1x32xf32, #tpu.memory_space<vmem>>, vector<1x32xf32>
    %282 = vector.broadcast %281 : vector<1x32xf32> to vector<8x32xf32>
    %283 = arith.mulf %280, %282 : vector<8x32xf32>
    %c0_126 = arith.constant 0 : index
    %c0_127 = arith.constant 0 : index
    %284 = vector.load %arg28[%c0_126, %c0_127] : memref<1x32xf32, #tpu.memory_space<vmem>>, vector<1x32xf32>
    %285 = vector.broadcast %284 : vector<1x32xf32> to vector<8x32xf32>
    %286 = arith.addf %283, %285 : vector<8x32xf32>
    %c0_128 = arith.constant 0 : index
    %c0_129 = arith.constant 0 : index
    %c0_130 = arith.constant 0 : index
    %287 = vector.load %arg29[%c0_128, %c0_129, %c0_130] : memref<1x8x32xf32, #tpu.memory_space<vmem>>, vector<1x8x32xf32>
    %288 = vector.shape_cast %287 : vector<1x8x32xf32> to vector<8x32xf32>
    %289 = vector.shape_cast %286 : vector<8x32xf32> to vector<1x8x32xf32>
    tpu.vector_store %arg29[%c0_128, %c0_129, %c0_130], %289 {strides = array<i32>} : memref<1x8x32xf32, #tpu.memory_space<vmem>>, vector<1x8x32xf32>,
    return
  }
  func.func @transform_0(%arg0: i32) -> (i32, i32, i32) {
    %c0_i32 = arith.constant 0 : i32
    %c0_i32_0 = arith.constant 0 : i32
    %c0_i32_1 = arith.constant 0 : i32
    return %arg0, %c0_i32, %c0_i32_0 : i32, i32, i32
  }
  func.func @transform_1(%arg0: i32) -> (i32, i32, i32) {
    %c0_i32 = arith.constant 0 : i32
    %c0_i32_0 = arith.constant 0 : i32
    %c0_i32_1 = arith.constant 0 : i32
    return %arg0, %c0_i32, %c0_i32_0 : i32, i32, i32
  }
  func.func @transform_2(%arg0: i32) -> (i32, i32) {
    %c0_i32 = arith.constant 0 : i32
    %c0_i32_0 = arith.constant 0 : i32
    %c0_i32_1 = arith.constant 0 : i32
    return %c0_i32, %c0_i32_0 : i32, i32
  }
  func.func @transform_3(%arg0: i32) -> (i32, i32) {
    %c0_i32 = arith.constant 0 : i32
    %c0_i32_0 = arith.constant 0 : i32
    %c0_i32_1 = arith.constant 0 : i32
    return %c0_i32, %c0_i32_0 : i32, i32
  }
  func.func @transform_4(%arg0: i32) -> (i32, i32) {
    %c0_i32 = arith.constant 0 : i32
    %c0_i32_0 = arith.constant 0 : i32
    %c0_i32_1 = arith.constant 0 : i32
    return %c0_i32, %c0_i32_0 : i32, i32
  }
  func.func @transform_5(%arg0: i32) -> (i32, i32) {
    %c0_i32 = arith.constant 0 : i32
    %c0_i32_0 = arith.constant 0 : i32
    %c0_i32_1 = arith.constant 0 : i32
    return %c0_i32, %c0_i32_0 : i32, i32
  }
  func.func @transform_6(%arg0: i32) -> (i32, i32) {
    %c0_i32 = arith.constant 0 : i32
    %c0_i32_0 = arith.constant 0 : i32
    %c0_i32_1 = arith.constant 0 : i32
    return %c0_i32, %c0_i32_0 : i32, i32
  }
  func.func @transform_7(%arg0: i32) -> (i32, i32) {
    %c0_i32 = arith.constant 0 : i32
    %c0_i32_0 = arith.constant 0 : i32
    %c0_i32_1 = arith.constant 0 : i32
    return %c0_i32, %c0_i32_0 : i32, i32
  }
  func.func @transform_8(%arg0: i32) -> (i32, i32) {
    %c0_i32 = arith.constant 0 : i32
    %c0_i32_0 = arith.constant 0 : i32
    %c0_i32_1 = arith.constant 0 : i32
    return %c0_i32, %c0_i32_0 : i32, i32
  }
  func.func @transform_9(%arg0: i32) -> (i32, i32) {
    %c0_i32 = arith.constant 0 : i32
    %c0_i32_0 = arith.constant 0 : i32
    %c0_i32_1 = arith.constant 0 : i32
    return %c0_i32, %c0_i32_0 : i32, i32
  }
  func.func @transform_10(%arg0: i32) -> (i32, i32) {
    %c0_i32 = arith.constant 0 : i32
    %c0_i32_0 = arith.constant 0 : i32
    %c0_i32_1 = arith.constant 0 : i32
    return %c0_i32, %c0_i32_0 : i32, i32
  }
  func.func @transform_11(%arg0: i32) -> (i32, i32) {
    %c0_i32 = arith.constant 0 : i32
    %c0_i32_0 = arith.constant 0 : i32
    %c0_i32_1 = arith.constant 0 : i32
    return %c0_i32, %c0_i32_0 : i32, i32
  }
  func.func @transform_12(%arg0: i32) -> (i32, i32) {
    %c0_i32 = arith.constant 0 : i32
    %c0_i32_0 = arith.constant 0 : i32
    %c0_i32_1 = arith.constant 0 : i32
    return %c0_i32, %c0_i32_0 : i32, i32
  }
  func.func @transform_13(%arg0: i32) -> (i32, i32) {
    %c0_i32 = arith.constant 0 : i32
    %c0_i32_0 = arith.constant 0 : i32
    %c0_i32_1 = arith.constant 0 : i32
    return %c0_i32, %c0_i32_0 : i32, i32
  }
  func.func @transform_14(%arg0: i32) -> (i32, i32) {
    %c0_i32 = arith.constant 0 : i32
    %c0_i32_0 = arith.constant 0 : i32
    %c0_i32_1 = arith.constant 0 : i32
    return %c0_i32, %c0_i32_0 : i32, i32
  }
  func.func @transform_15(%arg0: i32) -> (i32, i32) {
    %c0_i32 = arith.constant 0 : i32
    %c0_i32_0 = arith.constant 0 : i32
    %c0_i32_1 = arith.constant 0 : i32
    return %c0_i32, %c0_i32_0 : i32, i32
  }
  func.func @transform_16(%arg0: i32) -> (i32, i32) {
    %c0_i32 = arith.constant 0 : i32
    %c0_i32_0 = arith.constant 0 : i32
    %c0_i32_1 = arith.constant 0 : i32
    return %c0_i32, %c0_i32_0 : i32, i32
  }
  func.func @transform_17(%arg0: i32) -> (i32, i32) {
    %c0_i32 = arith.constant 0 : i32
    %c0_i32_0 = arith.constant 0 : i32
    %c0_i32_1 = arith.constant 0 : i32
    return %c0_i32, %c0_i32_0 : i32, i32
  }
  func.func @transform_18(%arg0: i32) -> (i32, i32) {
    %c0_i32 = arith.constant 0 : i32
    %c0_i32_0 = arith.constant 0 : i32
    %c0_i32_1 = arith.constant 0 : i32
    return %c0_i32, %c0_i32_0 : i32, i32
  }
  func.func @transform_19(%arg0: i32) -> (i32, i32) {
    %c0_i32 = arith.constant 0 : i32
    %c0_i32_0 = arith.constant 0 : i32
    %c0_i32_1 = arith.constant 0 : i32
    return %c0_i32, %c0_i32_0 : i32, i32
  }
  func.func @transform_20(%arg0: i32) -> (i32, i32) {
    %c0_i32 = arith.constant 0 : i32
    %c0_i32_0 = arith.constant 0 : i32
    %c0_i32_1 = arith.constant 0 : i32
    return %c0_i32, %c0_i32_0 : i32, i32
  }
  func.func @transform_21(%arg0: i32) -> (i32, i32) {
    %c0_i32 = arith.constant 0 : i32
    %c0_i32_0 = arith.constant 0 : i32
    %c0_i32_1 = arith.constant 0 : i32
    return %c0_i32, %c0_i32_0 : i32, i32
  }
  func.func @transform_22(%arg0: i32) -> (i32, i32) {
    %c0_i32 = arith.constant 0 : i32
    %c0_i32_0 = arith.constant 0 : i32
    %c0_i32_1 = arith.constant 0 : i32
    return %c0_i32, %c0_i32_0 : i32, i32
  }
  func.func @transform_23(%arg0: i32) -> (i32, i32) {
    %c0_i32 = arith.constant 0 : i32
    %c0_i32_0 = arith.constant 0 : i32
    %c0_i32_1 = arith.constant 0 : i32
    return %c0_i32, %c0_i32_0 : i32, i32
  }
  func.func @transform_24(%arg0: i32) -> (i32, i32) {
    %c0_i32 = arith.constant 0 : i32
    %c0_i32_0 = arith.constant 0 : i32
    %c0_i32_1 = arith.constant 0 : i32
    return %c0_i32, %c0_i32_0 : i32, i32
  }
  func.func @transform_25(%arg0: i32) -> (i32, i32) {
    %c0_i32 = arith.constant 0 : i32
    %c0_i32_0 = arith.constant 0 : i32
    %c0_i32_1 = arith.constant 0 : i32
    return %c0_i32, %c0_i32_0 : i32, i32
  }
  func.func @transform_26(%arg0: i32) -> (i32, i32) {
    %c0_i32 = arith.constant 0 : i32
    %c0_i32_0 = arith.constant 0 : i32
    %c0_i32_1 = arith.constant 0 : i32
    return %c0_i32, %c0_i32_0 : i32, i32
  }
  func.func @transform_27(%arg0: i32) -> (i32, i32) {
    %c0_i32 = arith.constant 0 : i32
    %c0_i32_0 = arith.constant 0 : i32
    %c0_i32_1 = arith.constant 0 : i32
    return %c0_i32, %c0_i32_0 : i32, i32
  }
  func.func @transform_28(%arg0: i32) -> (i32, i32, i32) {
    %c0_i32 = arith.constant 0 : i32
    %c0_i32_0 = arith.constant 0 : i32
    %c0_i32_1 = arith.constant 0 : i32
    return %arg0, %c0_i32, %c0_i32_0 : i32, i32, i32
  }
}

</mosaic_0001>

<bundles_post_ra>
// kernel: tpu_custom_call.1
= control target key start
LH: loop header
LB: loop body
LE: loop exit
PB: predicated region body
PF: predicated region fallthrough
CT: control target
= control target key end

     0   :  { %s3330_s0 = inlined_call_operand.hbm [shape: f32[2,8,32], index: 0, kind: input, shape index: {}]   ;;  %s3331_s1 = inlined_call_operand.vmem [shape: f32[2,16,32], index: 1, kind: input, shape index: {}]   ;;  %s3332_s2 = inlined_call_operand.vmem [shape: f32[32,32], index: 2, kind: input, shape index: {}]   ;;  %s3333_s3 = inlined_call_operand.vmem [shape: f32[1,32], index: 3, kind: input, shape index: {}]   ;;  %s3334_s4 = inlined_call_operand.vmem [shape: f32[32,32], index: 4, kind: input, shape index: {}]   ;;  %s3335_s5 = inlined_call_operand.vmem [shape: f32[1,32], index: 5, kind: input, shape index: {}]   ;;  %s3336_s6 = inlined_call_operand.vmem [shape: f32[32,32], index: 6, kind: input, shape index: {}]   ;;  %s3337_s7 = inlined_call_operand.vmem [shape: f32[1,32], index: 7, kind: input, shape index: {}]   ;;  %s3338_s8 = inlined_call_operand.vmem [shape: f32[32,32], index: 8, kind: input, shape index: {}]   ;;  %s3339_s9 = inlined_call_operand.vmem [shape: f32[1,32], index: 9, kind: input, shape index: {}]   ;;  %s3340_s10 = inlined_call_operand.hbm [shape: f32[32,32], index: 10, kind: input, shape index: {}]   ;;  %s3341_s11 = inlined_call_operand.vmem [shape: f32[1,32], index: 11, kind: input, shape index: {}]   ;;  %s3342_s12 = inlined_call_operand.hbm [shape: f32[32,32], index: 12, kind: input, shape index: {}]   ;;  %s3343_s13 = inlined_call_operand.vmem [shape: f32[1,32], index: 13, kind: input, shape index: {}]   ;;  %s3344_s14 = inlined_call_operand.hbm [shape: f32[32,32], index: 14, kind: input, shape index: {}]   ;;  %s3345_s15 = inlined_call_operand.vmem [shape: f32[1,32], index: 15, kind: input, shape index: {}]   ;;  %s3346_s16 = inlined_call_operand.hbm [shape: f32[32,32], index: 16, kind: input, shape index: {}]   ;;  %s3347_s17 = inlined_call_operand.vmem [shape: f32[1,32], index: 17, kind: input, shape index: {}]   ;;  %s3348_s18 = inlined_call_operand.hbm [shape: f32[32,128], index: 18, kind: input, shape index: {}]   ;;  %s3349_s19 = inlined_call_operand.vmem [shape: f32[1,128], index: 19, kind: input, shape index: {}]   ;;  %s3350_s20 = inlined_call_operand.vmem [shape: f32[128,32], index: 20, kind: input, shape index: {}]   ;;  %s3351_s21 = inlined_call_operand.vmem [shape: f32[1,32], index: 21, kind: input, shape index: {}]   ;;  %s3352_s22 = inlined_call_operand.vmem [shape: f32[1,32], index: 22, kind: input, shape index: {}]   ;;  %s3353_s23 = inlined_call_operand.vmem [shape: f32[1,32], index: 23, kind: input, shape index: {}]   ;;  %s3354_s24 = inlined_call_operand.vmem [shape: f32[1,32], index: 24, kind: input, shape index: {}]   ;;  %s3355_s25 = inlined_call_operand.vmem [shape: f32[1,32], index: 25, kind: input, shape index: {}]   ;;  %s3356_s26 = inlined_call_operand.vmem [shape: f32[1,32], index: 26, kind: input, shape index: {}]   ;;  %s3357_s27 = inlined_call_operand.vmem [shape: f32[1,32], index: 27, kind: input, shape index: {}]   ;;  %s3358_s28 = inlined_call_operand.hbm [shape: f32[2,8,32], index: 28, kind: output, shape index: {}]  }
   0x1   :  { %3369 = sst [smem:[#allocation20_spill]] %s3330_s0 }
   0x2   :  { %3370 = sst [smem:[#allocation21_spill]] %s3331_s1 }
   0x3   :  { %3371 = sst [smem:[#allocation22_spill]] %s3332_s2 }
   0x4   :  { %3372 = sst [smem:[#allocation23_spill]] %s3333_s3 }
   0x5   :  { %3373 = sst [smem:[#allocation24_spill]] %s3334_s4 }
   0x6   :  { %3374 = sst [smem:[#allocation25_spill]] %s3335_s5 }
   0x7   :  { %3375 = sst [smem:[#allocation26_spill]] %s3336_s6 }
   0x8   :  { %3376 = sst [smem:[#allocation27_spill]] %s3337_s7 }
   0x9   :  { %3377 = sst [smem:[#allocation28_spill]] %s3338_s8 }
   0xa   :  { %3378 = sst [smem:[#allocation29_spill]] %s3339_s9 }
   0xb   :  { %3379 = sst [smem:[#allocation30_spill]] %s3340_s10 }
   0xc   :  { %3380 = sst [smem:[#allocation31_spill]] %s3341_s11 }
   0xd   :  { %3381 = sst [smem:[#allocation32_spill]] %s3342_s12 }
   0xe   :  { %3382 = sst [smem:[#allocation33_spill]] %s3343_s13 }
   0xf   :  { %3383 = sst [smem:[#allocation34_spill]] %s3344_s14 }
  0x10   :  { %3384 = sst [smem:[#allocation35_spill]] %s3346_s16 }
  0x11   :  { %3385 = sst [smem:[#allocation36_spill]] %s3348_s18 }
  0x12   :  { %3386 = sst [smem:[#allocation37_spill]] %s3349_s19 }
  0x13   :  { %3387 = sst [smem:[#allocation38_spill]] %s3351_s21 }
  0x14   :  { %3388 = sst [smem:[#allocation39_spill]] %s3355_s25 }
  0x15   :  { %3389 = sst [smem:[#allocation40_spill]] %s3356_s26 }
  0x16   :  { %3390 = sst [smem:[#allocation41_spill]] %s3357_s27 }
  0x17   :  { %3391 = sst [smem:[#allocation42_spill]] %s3358_s28 }
  0x18   :  { %33 = vsyncpa [#allocation3], 0 }
  0x19   :  { %35 = vsyncpa [#allocation3 + $0x1], 0 }
  0x1a   :  { %36 = vsyncpa [#allocation6], 0 }
  0x1b   :  { %37 = vsyncpa [#allocation9], 0 }
  0x1c   :  { %38 = vsyncpa [#allocation12], 0 }
  0x1d   :  { %39 = vsyncpa [#allocation4], 0 }
  0x1e   :  { %41 = vsyncpa [#allocation4 + $0x1], 0  ;;  %s2894_s8 = smov 0   ;;  %s2896_s5 = smov 0  }
  0x1f   :  { %s2898_s9 = smov 0   ;;  %s2900_s30 = smov 0  }
  0x20 LB: > { %s3392_s10 = sld [smem:[#allocation30_spill]]  ;;  %s2918_s11 = sadd.s32 4294967295, %s2736_s30   ;;  %s2736_s30 = sphi %s2900_s30, %s3428_s30   ;;  %s2732_s9 = sphi %s2898_s9, %s3427_s9   ;;  %s2728_s5 = sphi %s2896_s5, %s3426_s5   ;;  %s2724_s8 = sphi %s2894_s8, %s3425_s8  }
  0x21   : > { %p2235_p0 = scmp.ge.s32.totalorder %s2736_s30, 1  ;;  %p68_p1 = scmp.eq.s32.totalorder %s2918_s11, 0 }
  0x22   : > { %p676_p2 = scmp.lt.s32.totalorder %s2736_s30, 3  ;;  %s2738_s2 = smov [#allocation5]  }
  0x23   : > { %s713_s7 = sshll.u32 %s2738_s2, 4  ;;  %s3394_s14 = sld [smem:[#allocation34_spill]]  ;;  %s714_s7 = int_to_ptr.vmem [resolvable:$true] %s713_s7 }
  0x24   : > { %p2923_p3 = pnand %p2235_p0, %p676_p2  ;;  %s3396_s2 = sld [smem:[#allocation32_spill]] }
  0x25   : > { %s2739_s28 = smov [#allocation8]   ;;  %s2740_s21 = smov 128  }
  0x26   : > { %s711_s0 = sshll.u32 %s3392_s10, 4  ;;  %p2328_p4 = pneg %p2923_p3  ;;  %s712_s0 = int_to_ptr.hbm [resolvable:$true] %s711_s0 }
  0x27   : > { %s747_s26 = sshll.u32 %s2739_s28, 4  ;;  %s2741_s19 = smov 8   ;;  %s748_s26 = int_to_ptr.vmem [resolvable:$true] %s747_s26 }
  0x28   : > { %p2935_p6 = pnand %p2328_p4, %p68_p1  ;;  %s3397_s16 = sld [smem:[#allocation35_spill]] }
  0x29   : > { %s745_s4 = sshll.u32 %s3394_s14, 4  ;;  %s2742_s25 = smov [#allocation7]   ;;  %s746_s4 = int_to_ptr.hbm [resolvable:$true] %s745_s4 }
  0x2a   : > { %s728_s27 = sshll.u32 %s3396_s2, 4  ;;  %s730_s6 = sshll.u32 %s2742_s25, 4  ;;  %s729_s27 = int_to_ptr.hbm [resolvable:$true] %s728_s27  ;;  %s731_s6 = int_to_ptr.vmem [resolvable:$true] %s730_s6 }
  0x2b   : > { %2331 = dma.hbm_to_vmem [thread:$0]  (!%p2935_p6), %s712_s0, 512, %s714_s7, [#allocation6], %s2740_s21, %s2740_s21, %s2741_s19  }
  0x2c   : > { %2337 = dma.hbm_to_vmem [thread:$0]  (!%p2935_p6), %s746_s4, 512, %s748_s26, [#allocation9], %s2740_s21, %s2740_s21, %s2741_s19  }
  0x2d   : > { %2334 = dma.hbm_to_vmem [thread:$0]  (!%p2935_p6), %s729_s27, 512, %s731_s6, [#allocation6], %s2740_s21, %s2740_s21, %s2741_s19  }
  0x2e   : > { %s762_s14 = sshll.u32 %s3397_s16, 4  ;;  %s2743_s28 = smov [#allocation10]   ;;  %s763_s14 = int_to_ptr.hbm [resolvable:$true] %s762_s14 }
  0x2f   : > { %s764_s26 = sshll.u32 %s2743_s28, 4  ;;  %s3398_s18 = sld [smem:[#allocation36_spill]]  ;;  %s765_s26 = int_to_ptr.vmem [resolvable:$true] %s764_s26 }
  0x30   : > { %2340 = dma.hbm_to_vmem [thread:$0]  (!%p2935_p6), %s763_s14, 512, %s765_s26, [#allocation9], %s2740_s21, %s2740_s21, %s2741_s19  }
  0x31   : > { %s2744_s25 = smov [#allocation11]   ;;  %s2234_s27 = sadd.s32 4294967294, %s2736_s30  }
  0x32   : > { %s781_s10 = sshll.u32 %s2744_s25, 4  ;;  %s2960_s2 = sadd.s32 1, %s2736_s30   ;;  %s782_s10 = int_to_ptr.vmem [resolvable:$true] %s781_s10 }
  0x33   : > { %s54_s12 = sadd.s32 1, %s2732_s9  ;;  %s51_s1 = ssub.s32 %s2736_s30, %s2960_s2 }
  0x34   : > { %p61_p7 = scmp.ne.s32.totalorder %s2732_s9, %s2728_s5  ;;  %p52_p8 = scmp.eq.s32.totalorder %s51_s1, 0 }
  0x35   : > { %s779_s4 = sshll.u32 %s3398_s18, 4  ;;  %p62_p9 = scmp.eq.s32.totalorder %s2736_s30, 0  ;;  %s780_s4 = int_to_ptr.hbm [resolvable:$true] %s779_s4 }
  0x36   : > { %2343 = dma.hbm_to_vmem [thread:$0]  (!%p2935_p6), %s780_s4, 512, %s782_s10, [#allocation12], %s2740_s21, %s2740_s21, %s2741_s19  }
  0x37   : > { %p67_p10 = scmp.ne.s32.totalorder %s2728_s5, %s2724_s8  ;;  %p663_p11 = scmp.eq.s32.totalorder %s2918_s11, 1 }
  0x38   : > { %s2972_s14 = scalar_select %p52_p8, %s2732_s9, %s54_s12  }
  0x39   : > { %p2976_p12 = por %p68_p1, %p67_p10  ;;  %p2980_p13 = por %p663_p11, %p61_p7 }
  0x3a   : > { %3399 = sst [smem:[#allocation19_spill]] %s2972_s14  ;;  %p669_p0 = scmp.eq.s32.totalorder %s2234_s27, 1 }
  0x3b   : > { %p63_p2 = por %p62_p9, %p61_p7  ;;  %s822_s21 = sand.u32 1, %s2732_s9  }
  0x3c   : > { %p2985_p4 = por %p669_p0, %p67_p10  ;;  %p2357_p6 = scmp.lt.s32.totalorder %s2736_s30, 2 }
  0x3d   : > { %s2242_s28 = sshll.u32 %s822_s21, 3  ;;  %s2243_s26 = sshll.u32 %s2736_s30, 3 }
  0x3e   : > { %s3403_s4 = sld [smem:[#allocation20_spill]]  ;;  %s826_s12 = scalar_lea.vmem [#allocation2], %s2242_s28 }
  0x3f   : > { %s834_s1 = sshll.u32 %s826_s12, 4  ;;  %p2994_p8 = pnand %p2357_p6, %p63_p2  ;;  %s835_s1 = int_to_ptr.vmem [resolvable:$true] %s834_s1 }
  0x40   : > { %s823_s16 = scalar_lea.sflag [#allocation3], %s822_s21 }
  0x41   : > { %p2632_p9 = pneg %p2994_p8 }
  0x44   : > { %s830_s25 = scalar_lea.hbm %s3403_s4, %s2243_s26  ;;  %s2635_s28 = scalar_lea.hbm %s3403_s4, 16 }
  0x45   : > { %s832_s10 = sshll.u32 %s830_s25, 4  ;;  %s833_s10 = int_to_ptr.hbm [resolvable:$true] %s832_s10 }
  0x46   : > { %s2628_s18 = sshra.s32 %s833_s10, 4  ;;  %s2629_s18 = int_to_ptr.hbm [resolvable:$true] %s2628_s18 }
  0x47   : > { %s2630_s14 = scalar_lea.hbm %s2629_s18, 8  ;;  %p2636_p0 = scmp.lt.s32.totalorder %s2629_s18, %s3403_s4 }
  0x48   : > { %p2631_p7 = scmp.ne.s32.totalorder %s2629_s18, %s2630_s14  ;;  %p2637_p2 = scmp.lt.s32.totalorder %s2635_s28, %s2630_s14 }
  0x4a   : > { %p2633_p10 = pnand %p2632_p9, %p2631_p7  ;;  %p2638_p6 = por %p2637_p2, %p2636_p0 }
  0x4c   : > { %p2634_p11 = pneg %p2633_p10 }
  0x4e   : > { %p2639_p5 = pnand %p2638_p6, %p2634_p11 }
  0x50   : > { %2642 = shalt.err (!%p2639_p5)
}
  0x51   : > { %2347 = dma.hbm_to_vmem [thread:$0]  (!%p2994_p8), %s833_s10, 128, %s835_s1, %s823_s16  }
  0x52   : > { %851 = sbr.rel (%p2923_p3) target bundleno = 3297 (0xce1), region = 132  ;;  %s3011_s21 = sand.u32 (!%p2923_p3), 1, %s2728_s5  }
  0x53   : > { %s3365_s12 = sshll.u32 (!%p2923_p3), %s3011_s21, 3  ;;  %s854_s26 = scalar_lea.sflag (!%p2923_p3), [#allocation3], %s3011_s21 }
  0x54   : > { %s857_s18 = scalar_lea.vmem (!%p2923_p3), [#allocation2], %s3365_s12 }
  0x57   : > { %2703 = dma.done.wait (%p2976_p12), %s854_s26, 128  }
  0x58   : > { %2705 = vsyncadd (%p2976_p12), %s854_s26, 4294967168 }
  0x59   : > { %2707 = dma.done.wait (%p68_p1), [#allocation6], 1024  }
  0x5a   : > { %2709 = vsyncadd (%p68_p1), [#allocation6], 4294966272 }
  0x5b   : > { %2711 = dma.done.wait (%p68_p1), [#allocation9], 1024  }
  0x5c   : > { %2713 = vsyncadd (%p68_p1), [#allocation9], 4294966272 }
  0x5d   : > { %2715 = dma.done.wait (%p68_p1), [#allocation12], 512  }
  0x5e   : > { %2717 = vsyncadd (%p68_p1), [#allocation12], 4294966784  ;;  %s3405_s14 = sld [smem:[#allocation22_spill]]  ;;  %v3057_v8 = vld [vmem:[%s857_s18] sm:$0xff]  ;;  %vm977_vm0 = vcmask 261120   ;;  %vm1061_vm1 = vcmask 64512  }
  0x5f   : > { %s3406_s1 = sld [smem:[#allocation24_spill]]  ;;  %s2745_s18 = smov 120   ;;  %vm1594_vm6 = vcmask 130048  }
  0x60   : > { %s3407_s25 = sld [smem:[#allocation25_spill]]  ;;  %s2746_s3 = smov 112  }
  0x61   : > { %s3408_s29 = sld [smem:[#allocation23_spill]]  ;;  %s2747_s10 = smov 104  }
  0x62   : > { %s3409_s28 = sld [smem:[#allocation26_spill]]  ;;  %p961_p1 = scmp.lt.s32.totalorder %s2918_s11, 1 }
  0x63   : > { %s3410_s12 = sld [smem:[#allocation27_spill]] }
  0x64   : > { %v972_v0 = vld [vmem:[%s3405_s14 + $0x18] sm:$0xff]  ;;  %v971_v2 = vld [vmem:[%s3405_s14 + $0x10] sm:$0xff]  ;;  %v970_v4 = vld [vmem:[%s3405_s14 + $0x8] sm:$0xff]  ;;  %s3411_s26 = sld [smem:[#allocation28_spill]] }
  0x65   : > { %v1004_v1 = vld [vmem:[%s3406_s1 + $0x18] sm:$0xff]  ;;  %993 = vmatpush.msra.mxu2 %v972_v0  ;;  %v1003_v3 = vld [vmem:[%s3406_s1 + $0x10] sm:$0xff]  ;;  %v1002_v5 = vld [vmem:[%s3406_s1 + $0x8] sm:$0xff]  ;;  %s962_s27 = scalar_select %p961_p1, %s2918_s11, 1 }
  0x66   : > { %1021 = vmatpush.msra.mxu1 %v1004_v1  ;;  %v969_v6 = vld [vmem:[%s3405_s14] sm:$0xff]  ;;  %s3414_s13 = sld [smem:[#allocation33_spill]] }
  0x67   : > { %v1001_v7 = vld [vmem:[%s3406_s1] sm:$0xff]  ;;  %994 = vmatpush.msra.mxu2 %v971_v2  ;;  %s2303_s0 = sshll.u32 %s962_s27, 4  ;;  %s3421_s1 = sld [smem:[#allocation41_spill]] }
  0x68   : > { %1022 = vmatpush.msra.mxu1 %v1003_v3  ;;  %v2422_v9 = vld [vmem:[%s3407_s25] ss:$0 sm:$0xff]  ;;  %v1032_v15 = vld [vmem:[%s3409_s28 + $0x18] sm:$0xff]  ;;  %v1031_v16 = vld [vmem:[%s3409_s28 + $0x10] sm:$0xff]  ;;  %s3413_s25 = sld [smem:[#allocation21_spill]] }
  0x69   : > { %995 = vmatpush.msra.mxu2 %v970_v4  ;;  %v2423_v12 = vld [vmem:[%s3408_s29] ss:$0 sm:$0xff]  ;;  %v1030_v17 = vld [vmem:[%s3409_s28 + $0x8] sm:$0xff]  ;;  %s3412_s29 = sld [smem:[#allocation29_spill]] }
  0x6a   : > { %1023 = vmatpush.msra.mxu1 %v1002_v5  ;;  %v1029_v18 = vld [vmem:[%s3409_s28] sm:$0xff]  ;;  %v1058_v52 = vld [vmem:[%s3411_s26 + $0x8] sm:$0xff] }
  0x6b   : > { %996 = vmatpush.msra.mxu2 %v969_v6  ;;  %v2424_v24 = vld [vmem:[%s3410_s12] ss:$0 sm:$0xff]  ;;  %s3415_s12 = sld [smem:[#allocation31_spill]] }
  0x6c   : > { %1024 = vmatpush.msra.mxu1 %v1001_v7  ;;  %2254 = vmatmul.msk.f32.vlgmr.msra.gmra.mxu2 %vm977_vm0, %v3057_v8  ;;  %v1057_v35 = vld [vmem:[%s3411_s26] sm:$0xff] }
  0x6d   : > { %2255 = vmatmul.msk.f32.vlgmr.msra.gmra.mxu1 %vm977_vm0, %v3057_v8  ;;  %1049 = vmatpush.msrb.mxu2 %v1032_v15 }
  0x6e   : > { %s965_s16 = scalar_lea.vmem %s3413_s25, %s2303_s0  ;;  %s3418_s25 = sld [smem:[#allocation38_spill]] }
  0x6f   : > { %1050 = vmatpush.msrb.mxu2 %v1031_v16  ;;  %s3419_s0 = sld [smem:[#allocation40_spill]] }
  0x71   : > { %1051 = vmatpush.msrb.mxu2 %v1030_v17 }
  0x73   : > { %1052 = vmatpush.msrb.mxu2 %v1029_v18 }
  0x74   : > { %2256 = vmatmul.msk.f32.vlgmr.msrb.gmra.mxu2 %vm977_vm0, %v3057_v8 }
  0x75   : > { %1208 = vmatpush.msra.mxu2 %v1058_v52 }
  0xea   : > { %v1026_v10 = vpop.f32.mrf.mxu1 }
  0xeb   : > { %v1027_v11 = vadd.f32 %v2422_v9, %v1026_v10 }
  0xed   : > { %1125 = vrot.lane.b32.xlu0 %v1027_v11, %s2745_s18  ;;  %2257 = vmatpush.xpose.msk.msra.mxu3 %vm1061_vm1, %v1027_v11 }
  0xef   : > { %v998_v13 = vpop.f32.mrf.mxu2 }
  0xf0   : > { %v999_v14 = vadd.f32 %v2423_v12, %v998_v13  ;;  %v1060_v12 = vld [vmem:[%s3411_s26 + $0x18] sm:$0xff] }
  0xf2   : > { %2258 = vmatmul.msk.f32.vlgmr.msra.gmra.mxu3 %vm1061_vm1, %v999_v14 }
  0xf5   : > { %1123 = vrot.lane.b32.xlu0 %v999_v14, %s2745_s18 }
  0xf7   : > { %v1054_v25 = vpop.f32.mrf.mxu2 }
  0xf8   : > { %v1055_v26 = vadd.f32 %v2424_v24, %v1054_v25  ;;  %v2425_v25 = vld [vmem:[%s3412_s29] ss:$0 sm:$0xff]  ;;  %s2089_s29 = scalar_lea.sflag [#allocation4], %s3011_s21 }
  0xfa   : > { %1117 = vmatpush.msrb.mxu3 %v1055_v26 }
  0xfc   : > { %1231 = vmatpush.msra.mxu3 %v1057_v35 }
  0xfd   : > { %1238 = vrot.lane.b32.xlu0 %v1027_v11, %s2746_s3 }
 0x105   : > { %1236 = vrot.lane.b32.xlu0 %v999_v14, %s2746_s3 }
 0x10d   : > { %1326 = vrot.lane.b32.xlu0 %v999_v14, %s2747_s10 }
 0x15f   : > { %v1126_v19 = vpop.permute.xlu0 %1125 }
 0x160   : > { %2260 = vmatpush.xpose.msk.msra.mxu0 %vm1061_vm1, %v1126_v19 }
 0x167   : > { %v1124_v20 = vpop.permute.xlu0 %1123 }
 0x168   : > { %2261 = vmatmul.msk.f32.vlgmr.msra.gmra.mxu0 %vm1061_vm1, %v1124_v20 }
 0x16f   : > { %v1239_v42 = vpop.permute.xlu0 %1238 }
 0x175   : > { %v1085_v21 = vpop.f32.mrf.mxu3 }
 0x176   : > { %v1088_v22 = vmul.f32 0.35355338, %v1085_v21 }
 0x177   : > { %v1237_v45 = vpop.permute.xlu0 %1236 }
 0x178   : > { %v1089_v23 = vsel %vm1061_vm1, %v1088_v22, -inf }
 0x179   : > { %1090 = vmax.xlane.f32.xlu1 %v1089_v23 }
 0x17f   : > { %v1327_v51 = vpop.permute.xlu0 %1326 }
 0x1e5   : > { %v1148_v27 = vpop.f32.mrf.mxu0 }
 0x1e6   : > { %v1151_v28 = vmul.f32 0.35355338, %v1148_v27 }
 0x1e8   : > { %v1152_v29 = vsel %vm1061_vm1, %v1151_v28, -inf }
 0x1e9   : > { %1153 = vmax.xlane.f32.xlu1 %v1152_v29 }
 0x1ec   : > { %v1091_v30 = vpop.xlane.xlu1 %1090 }
 0x1ed   : > { %v1092_v31 = vsub.f32 %v1088_v22, %v1091_v30 }
 0x1ef   : > { %v1093_v32 = vmul.f32 1.442695, %v1092_v31  ;;  %v2748_v31 = vmov 32.0  }
 0x1f1   : > { %2438 = vpow2.f32 %v1093_v32  ;;  %v1495_v32 = vld [vmem:[#allocation7 + $0x18] sm:$0xff] }
 0x1f7   : > { %v2439_v33 = vpop.eup %2438 }
 0x1f8   : > { %2259 = vmatmul.msk.f32.vlgmr.msrb.gmra.mxu3 %vm1061_vm1, %v2439_v33  ;;  %v1095_v34 = vsel %vm1061_vm1, %v2439_v33, 0.0  ;;  %v1494_v33 = vld [vmem:[#allocation7 + $0x10] sm:$0xff] }
 0x1f9   : > { %1096 = vadd.xlane.f32.xlu2 %v1095_v34  ;;  %v1493_v34 = vld [vmem:[#allocation7 + $0x8] sm:$0xff] }
 0x202   : > { %1328 = vrot.lane.b32.xlu1 %v1027_v11, %s2747_s10  ;;  %v1059_v11 = vld [vmem:[%s3411_s26 + $0x10] sm:$0xff] }
 0x203   : > { %1320 = vmatpush.msrb.mxu2 %v1059_v11 }
 0x20a   : > { %1275 = vrot.lane.b32.xlu1 %v1055_v26, %s2746_s3 }
 0x211   : > { %1163 = vrot.lane.b32.xlu2 %v1055_v26, %s2745_s18 }
 0x212   : > { %1365 = vrot.lane.b32.xlu1 %v1055_v26, %s2747_s10 }
 0x25c   : > { %v1154_v36 = vpop.xlane.xlu1 %1153 }
 0x25d   : > { %v1155_v37 = vsub.f32 %v1151_v28, %v1154_v36  ;;  %v1492_v36 = vld [vmem:[#allocation7] sm:$0xff] }
 0x25f   : > { %v1156_v38 = vmul.f32 1.442695, %v1155_v37 }
 0x261   : > { %2440 = vpow2.f32 %v1156_v38 }
 0x267   : > { %v2441_v39 = vpop.eup %2440 }
 0x268   : > { %v1158_v40 = vsel %vm1061_vm1, %v2441_v39, 0.0 }
 0x269   : > { %1159 = vadd.xlane.f32.xlu1 %v1158_v40 }
 0x26c   : > { %v1097_v41 = vpop.xlane.xlu2 %1096 }
 0x26d   : > { %2442 = vrcp.f32 %v1097_v41 }
 0x273   : > { %v2443_v46 = vpop.eup %2442 }
 0x274   : > { %v1329_v43 = vpop.permute.xlu1 %1328  ;;  %v1164_v44 = vpop.permute.xlu2 %1163 }
 0x275   : > { %2269 = vmatpush.xpose.msk.msrb.mxu3 %vm1061_vm1, %v1329_v43  ;;  %1184 = vmatpush.msrb.mxu0 %v1164_v44 }
 0x276   : > { %2262 = vmatmul.msk.f32.vlgmr.msrb.gmra.mxu0 %vm1061_vm1, %v2441_v39  ;;  %v968_v39 = vld [vmem:[%s965_s16 + $0x8] sm:$0xff] }
 0x277   : > { %2265 = vmatpush.xpose.msk.msra.mxu0 %vm1061_vm1, %v1239_v42 }
 0x27b   : > { %v1119_v47 = vpop.f32.mrf.mxu3 }
 0x27c   : > { %v1276_v48 = vpop.permute.xlu1 %1275  ;;  %v1122_v49 = vmul.f32 %v2443_v46, %v1119_v47 }
 0x27d   : > { %1296 = vmatpush.msrb.mxu1 %v1276_v48  ;;  %v1464_v48 = vld [vmem:[#allocation5 + $0x18] sm:$0xff] }
 0x27e   : > { %2264 = vmatmul.msk.f32.vlgmr.msra.gmra.mxu3 %vm1061_vm1, %v1122_v49  ;;  %2266 = vmatmul.msk.f32.vlgmr.msra.gmra.mxu0 %vm1061_vm1, %v1237_v45  ;;  %v1463_v49 = vld [vmem:[#allocation5 + $0x10] sm:$0xff] }
 0x27f   : > { %1410 = vmatpush.msra.mxu1 %v1060_v12  ;;  %1518 = vmatpush.msra.mxu3 %v1495_v32 }
 0x281   : > { %1519 = vmatpush.msra.mxu3 %v1494_v33 }
 0x283   : > { %1520 = vmatpush.msra.mxu3 %v1493_v34 }
 0x284   : > { %v1366_v50 = vpop.permute.xlu1 %1365 }
 0x285   : > { %1386 = vmatpush.msrb.mxu0 %v1366_v50  ;;  %1521 = vmatpush.msra.mxu3 %v1492_v36  ;;  %v1462_v50 = vld [vmem:[#allocation5 + $0x8] sm:$0xff] }
 0x286   : > { %2270 = vmatmul.msk.f32.vlgmr.msrb.gmra.mxu3 %vm1061_vm1, %v1327_v51  ;;  %v1461_v51 = vld [vmem:[#allocation5] sm:$0xff] }
 0x2dc   : > { %v1160_v53 = vpop.xlane.xlu1 %1159 }
 0x2dd   : > { %2444 = vrcp.f32 %v1160_v53  ;;  %v1532_v53 = vld [vmem:[#allocation8 + $0x18] sm:$0xff] }
 0x2e3   : > { %v2445_v54 = vpop.eup %2444 }
 0x2f3   : > { %v1186_v55 = vpop.f32.mrf.mxu0 }
 0x2f4   : > { %v1189_v56 = vmul.f32 %v2445_v54, %v1186_v55  ;;  %v1531_v54 = vld [vmem:[#allocation8 + $0x10] sm:$0xff]  ;;  %v1530_v55 = vld [vmem:[#allocation8 + $0x8] sm:$0xff] }
 0x2f6   : > { %2263 = vmatmul.msk.f32.vlgmr.msra.gmra.mxu2 %vm1061_vm1, %v1189_v56 }
 0x2f7   : > { %1484 = vmatpush.msra.mxu2 %v1464_v48 }
 0x2f9   : > { %1485 = vmatpush.msra.mxu2 %v1463_v49 }
 0x2fb   : > { %v1261_v57 = vpop.f32.mrf.mxu0  ;;  %1486 = vmatpush.msra.mxu2 %v1462_v50 }
 0x2fc   : > { %v1264_v58 = vmul.f32 0.35355338, %v1261_v57 }
 0x2fd   : > { %1487 = vmatpush.msra.mxu2 %v1461_v51 }
 0x2fe   : > { %v1265_v59 = vsel %vm1061_vm1, %v1264_v58, -inf }
 0x2ff   : > { %1266 = vmax.xlane.f32.xlu2 %v1265_v59  ;;  %v2428_v59 = vld [vmem:[%s3414_s13] ss:$0 sm:$0xff] }
 0x301   : > { %v1233_v60 = vpop.f32.mrf.mxu3 }
 0x309   : > { %v1351_v61 = vpop.f32.mrf.mxu3 }
 0x30a   : > { %v1354_v62 = vmul.f32 0.35355338, %v1351_v61 }
 0x30c   : > { %v1355_v63 = vsel %vm1061_vm1, %v1354_v62, -inf }
 0x30d   : > { %1356 = vmax.xlane.f32.xlu0 %v1355_v63 }
 0x372   : > { %v1267_v0 = vpop.xlane.xlu2 %1266 }
 0x373   : > { %v1268_v1 = vsub.f32 %v1264_v58, %v1267_v0  ;;  %v1529_v58 = vld [vmem:[#allocation8] sm:$0xff] }
 0x375   : > { %v1269_v2 = vmul.f32 1.442695, %v1268_v1 }
 0x377   : > { %2446 = vpow2.f32 %v1269_v2 }
 0x379   : > { %v1210_v21 = vpop.f32.mrf.mxu2 }
 0x37a   : > { %v1234_v23 = vadd.f32 %v1233_v60, %v1210_v21 }
 0x37d   : > { %v2447_v3 = vpop.eup %2446 }
 0x37e   : > { %2267 = vmatmul.msk.f32.vlgmr.msrb.gmra.mxu1 %vm1061_vm1, %v2447_v3  ;;  %v1271_v4 = vsel %vm1061_vm1, %v2447_v3, 0.0 }
 0x37f   : > { %1272 = vadd.xlane.f32.xlu2 %v1271_v4  ;;  %1549 = vmatpush.msrb.mxu1 %v1532_v53 }
 0x380   : > { %v1357_v5 = vpop.xlane.xlu0 %1356 }
 0x381   : > { %v1358_v6 = vsub.f32 %v1354_v62, %v1357_v5  ;;  %1550 = vmatpush.msrb.mxu1 %v1531_v54 }
 0x383   : > { %v1359_v7 = vmul.f32 1.442695, %v1358_v6  ;;  %1551 = vmatpush.msrb.mxu1 %v1530_v55  ;;  %v2426_v6 = vld [vmem:[%s3352_s22] ss:$0 sm:$0xff] }
 0x385   : > { %2448 = vpow2.f32 %v1359_v7  ;;  %1552 = vmatpush.msrb.mxu1 %v1529_v58 }
 0x38b   : > { %v2449_v9 = vpop.eup %2448 }
 0x38c   : > { %2271 = vmatmul.msk.f32.vlgmr.msrb.gmra.mxu0 %vm1061_vm1, %v2449_v9  ;;  %v1361_v10 = vsel %vm1061_vm1, %v2449_v9, 0.0 }
 0x38d   : > { %1362 = vadd.xlane.f32.xlu2 %v1361_v10  ;;  %v2427_v10 = vld [vmem:[%s3353_s23] ss:$0 sm:$0xff] }
 0x3f2   : > { %v1273_v13 = vpop.xlane.xlu2 %1272 }
 0x3f3   : > { %2450 = vrcp.f32 %v1273_v13 }
 0x3f9   : > { %v2451_v14 = vpop.eup %2450 }
 0x3fb   : > { %v1298_v15 = vpop.f32.mrf.mxu1 }
 0x3fc   : > { %v1301_v16 = vmul.f32 %v2451_v14, %v1298_v15  ;;  %v1560_v14 = vld [vmem:[#allocation10] sm:$0xff] }
 0x3fd   : > { %1745 = vmatpush.msra.mxu0 %v1560_v14 }
 0x3fe   : > { %2268 = vmatmul.msk.f32.vlgmr.msrb.gmra.mxu2 %vm1061_vm1, %v1301_v16  ;;  %v2430_v16 = vld [vmem:[%s3345_s15] ss:$0 sm:$0xff] }
 0x400   : > { %v1363_v17 = vpop.xlane.xlu2 %1362 }
 0x401   : > { %2452 = vrcp.f32 %v1363_v17 }
 0x402   : > { %2454 = vrcp.f32 %v2748_v31 }
 0x407   : > { %v2453_v18 = vpop.eup %2452 }
 0x408   : > { %v2455_v35 = vpop.eup %2454 }
 0x409   : > { %v1388_v19 = vpop.f32.mrf.mxu0  ;;  %v1426_v37 = vmul.f32 32.0, %v2455_v35  ;;  %vm1430_vm2 = vweird.f32 %v2455_v35 }
 0x40a   : > { %v1391_v20 = vmul.f32 %v2453_v18, %v1388_v19 }
 0x40b   : > { %v1427_v38 = vsub.f32 1.0, %v1426_v37 }
 0x40c   : > { %2272 = vmatmul.msk.f32.vlgmr.msra.gmra.mxu1 %vm1061_vm1, %v1391_v20 }
 0x40d   : > { %v1428_v40 = vmul.f32 %v2455_v35, %v1427_v38 }
 0x40f   : > { %v1429_v41 = vadd.f32 %v2455_v35, %v1428_v40 }
 0x411   : > { %v3143_v42 = vsel %vm1430_vm2, %v2455_v35, %v1429_v41 }
 0x481   : > { %v1322_v22 = vpop.f32.mrf.mxu2 }
 0x482   : > { %v1325_v24 = vadd.f32 %v1322_v22, %v1234_v23  ;;  %v2429_v22 = vld [vmem:[%s3415_s12] ss:$0 sm:$0xff] }
 0x489   : > { %v1412_v26 = vpop.f32.mrf.mxu1 }
 0x48a   : > { %v1415_v27 = vadd.f32 %v1412_v26, %v1325_v24 }
 0x48c   : > { %v1420_v28 = vadd.f32 %v2425_v25, %v1415_v27 }
 0x48e   : > { %v1421_v29 = vadd.f32 %v1420_v28, %v3057_v8  ;;  %v967_v8 = vld [vmem:[%s965_s16] sm:$0xff]  ;;  %s2300_s16 = sshll.u32 %s2918_s11, 3  ;;  %s3422_s11 = sshll.u32 %s3011_s21, 3 }
 0x48f   : > { %2274 = vmatmul.msk.f32.vlgmr.msra.gmra.mxu3 %vm977_vm0, %v967_v8  ;;  %2276 = vmatmul.msk.f32.vlgmr.msrb.gmra.mxu1 %vm977_vm0, %v967_v8  ;;  %s960_s4 = scalar_lea.vmem [#allocation13], %s3422_s11 }
 0x490   : > { %v1422_v30 = vsel %vm977_vm0, %v1421_v29, 0.0  ;;  %s2101_s13 = sshll.u32 %s960_s4, 4  ;;  %s2102_s13 = int_to_ptr.vmem [resolvable:$true] %s2101_s13 }
 0x491   : > { %1423 = vadd.xlane.f32.xlu0 %v1422_v30 }
 0x497   : > { %2275 = vmatmul.msk.f32.gmra.mxu3 %vm977_vm0, %v968_v39  ;;  %2277 = vmatmul.msk.f32.gmra.mxu1 %vm977_vm0, %v968_v39 }
 0x504   : > { %v1424_v43 = vpop.xlane.xlu0 %1423 }
 0x505   : > { %v1432_v44 = vmul.f32 %v3143_v42, %v1424_v43 }
 0x507   : > { %v1433_v45 = vsub.f32 %v1421_v29, %v1432_v44 }
 0x509   : > { %v1434_v46 = vmul.f32 %v1433_v45, %v1433_v45 }
 0x50b   : > { %v1435_v47 = vsel %vm977_vm0, %v1434_v46, 0.0 }
 0x50c   : > { %1436 = vadd.xlane.f32.xlu2 %v1435_v47  ;;  %v1554_v15 = vpop.f32.mrf.mxu1 }
 0x50d   : > { %v1555_v19 = vadd.f32 %v2430_v16, %v1554_v15 }
 0x512   : > { %v1523_v52 = vpop.f32.mrf.mxu3 }
 0x513   : > { %v3152_v63 = vadd.f32 %v2428_v59, %v1523_v52 }
 0x514   : > { %v1557_v18 = vpop.f32.mrf.mxu1 }
 0x515   : > { %v1558_v20 = vadd.f32 %v2430_v16, %v1557_v18 }
 0x517   : > { %1622 = vmatpush.msrb.mxu2 %v1558_v20  ;;  %v2407_v28 = vpack.i.bf16 %v1555_v19, %v1558_v20 }
 0x519   : > { %1623 = vmatpush.msrb.mxu2 %v1555_v19 }
 0x51a   : > { %v1526_v61 = vpop.f32.mrf.mxu3 }
 0x51b   : > { %v1527_v62 = vadd.f32 %v2428_v59, %v1526_v61 }
 0x51d   : > { %2278 = vmatpush.xpose.msk.msra.mxu1 %vm1061_vm1, %v1527_v62 }
 0x521   : > { %2279 = vmatpush.xpose.msk.msra.mxu1 %vm1061_vm1, %v3152_v63 }
 0x524   : > { %1633 = vrot.lane.b32.xlu2 %v1527_v62, %s2745_s18 }
 0x52c   : > { %1752 = vrot.lane.b32.xlu2 %v3152_v63, %s2746_s3 }
 0x534   : > { %1851 = vrot.lane.b32.xlu2 %v1527_v62, %s2747_s10 }
 0x57f   : > { %v1437_v56 = vpop.xlane.xlu2 %1436 }
 0x580   : > { %v1438_v57 = vmul.f32 %v1437_v56, %v3143_v42 }
 0x582   : > { %v1439_v60 = vadd.f32 1e-05, %v1438_v57 }
 0x584   : > { %2456 = vrsqrt.f32 %v1439_v60  ;;  %vm1446_vm4 = vweird.f32 %v1439_v60 }
 0x587   : > { %v1634_v13 = vpop.permute.xlu2 %1633 }
 0x588   : > { %2282 = vmatpush.xpose.msk.msrb.mxu1 %vm1061_vm1, %v1634_v13 }
 0x58a   : > { %v2457_v0 = vpop.eup %2456 }
 0x58b   : > { %v1441_v1 = vmul.f32 %v2457_v0, %v1439_v60  ;;  %vm1447_vm3 = vweird.f32 %v2457_v0 }
 0x58c   : > { %vm1448_vm5 = vmor %vm1446_vm4, %vm1447_vm3 }
 0x58d   : > { %v1442_v2 = vmul.f32 %v2457_v0, %v1441_v1 }
 0x58f   : > { %v1443_v3 = vmul.f32 0.5, %v1442_v2  ;;  %v1753_v17 = vpop.permute.xlu2 %1752 }
 0x591   : > { %v1444_v4 = vsub.f32 1.5, %v1443_v3 }
 0x593   : > { %v1445_v5 = vmul.f32 %v2457_v0, %v1444_v4 }
 0x595   : > { %v1449_v7 = vsel %vm1448_vm5, %v2457_v0, %v1445_v5 }
 0x596   : > { %v1450_v9 = vmul.f32 %v1449_v7, %v1433_v45 }
 0x597   : > { %v1852_v21 = vpop.permute.xlu2 %1851 }
 0x598   : > { %v1455_v11 = vmul.f32 %v2426_v6, %v1450_v9  ;;  %2293 = vmatpush.xpose.msk.msrb.mxu0 %vm1061_vm1, %v1852_v21 }
 0x59a   : > { %v3168_v12 = vadd.f32 %v2427_v10, %v1455_v11  ;;  %v1561_v10 = vld [vmem:[#allocation10 + $0x8] sm:$0xff]  ;;  %v1562_v11 = vld [vmem:[#allocation10 + $0x10] sm:$0xff] }
 0x59b   : > { %1722 = vmatpush.msrb.mxu3 %v1561_v10 }
 0x59c   : > { %2273 = vmatmul.msk.f32.vlgmr.msra.gmra.mxu2 %vm977_vm0, %v3168_v12 }
 0x59d   : > { %1841 = vmatpush.msra.mxu3 %v1562_v11 }
 0x61f   : > { %v1489_v23 = vpop.f32.mrf.mxu2 }
 0x620   : > { %v1490_v24 = vadd.f32 %v2429_v22, %v1489_v23 }
 0x622   : > { %1629 = vrot.lane.b32.xlu1 %v1490_v24, %s2745_s18  ;;  %2280 = vmatmul.msk.f32.vlgmr.msra.gmra.mxu1 %vm1061_vm1, %v1490_v24 }
 0x694   : > { %v1630_v35 = vpop.permute.xlu1 %1629 }
 0x69f   : > { %v1590_v25 = vpop.f32.mrf.mxu1 }
 0x6a0   : > { %v1593_v26 = vmul.f32 0.35355338, %v1590_v25 }
 0x6a2   : > { %v1595_v27 = vsel %vm1594_vm6, %v1593_v26, -inf }
 0x6a3   : > { %1596 = vmax.xlane.f32.xlu0 %v1595_v27 }
 0x6b7   : > { %1631 = vrot.lane.b32.xlu0 %v3152_v63, %s2745_s18 }
 0x6bf   : > { %1754 = vrot.lane.b32.xlu0 %v1527_v62, %s2746_s3 }
 0x6c7   : > { %1750 = vrot.lane.b32.xlu0 %v1490_v24, %s2746_s3 }
 0x6cf   : > { %1847 = vrot.lane.b32.xlu0 %v1490_v24, %s2747_s10 }
 0x6d7   : > { %2408 = vrot.lane.b32.xlu0 %v2407_v28, %s2745_s18 }
 0x716   : > { %v1597_v29 = vpop.xlane.xlu0 %1596 }
 0x717   : > { %v1598_v30 = vsub.f32 %v1593_v26, %v1597_v29  ;;  %v1563_v26 = vld [vmem:[#allocation10 + $0x18] sm:$0xff] }
 0x719   : > { %v1599_v31 = vmul.f32 1.442695, %v1598_v30 }
 0x71b   : > { %2458 = vpow2.f32 %v1599_v31 }
 0x721   : > { %v2459_v32 = vpop.eup %2458 }
 0x722   : > { %2281 = vmatmul.msk.f32.vlgmr.msrb.gmra.mxu2 %vm1594_vm6, %v2459_v32  ;;  %v1601_v33 = vsel %vm1594_vm6, %v2459_v32, 0.0 }
 0x723   : > { %1602 = vadd.xlane.f32.xlu1 %v1601_v33 }
 0x729   : > { %v1632_v34 = vpop.permute.xlu0 %1631 }
 0x72a   : > { %2283 = vmatpush.xpose.msk.msrb.mxu1 %vm1061_vm1, %v1632_v34 }
 0x72d   : > { %2284 = vmatmul.msk.f32.vlgmr.msrb.gmra.mxu1 %vm1061_vm1, %v1630_v35  ;;  %v2431_v35 = vld [vmem:[%s3347_s17] ss:$0 sm:$0xff] }
 0x731   : > { %v1755_v36 = vpop.permute.xlu0 %1754 }
 0x732   : > { %2288 = vmatpush.xpose.msk.msra.mxu1 %vm1061_vm1, %v1755_v36 }
 0x736   : > { %2289 = vmatpush.xpose.msk.msra.mxu1 %vm1061_vm1, %v1753_v17 }
 0x739   : > { %v1751_v8 = vpop.permute.xlu0 %1750 }
 0x73a   : > { %2290 = vmatmul.msk.f32.vlgmr.msra.gmra.mxu1 %vm1061_vm1, %v1751_v8 }
 0x73c   : > { %1849 = vrot.lane.b32.xlu1 %v3152_v63, %s2747_s10 }
 0x741   : > { %v1848_v37 = vpop.permute.xlu0 %1847 }
 0x749   : > { %v2409_v38 = vpop.permute.xlu0 %2408 }
 0x74a   : > { %v2410_v39 = vunpack.i.l.bf16 %v2409_v38  ;;  %v2411_v40 = vunpack.i.h.bf16 %v2409_v38 }
 0x74c   : > { %1697 = vmatpush.msra.mxu2 %v2410_v39 }
 0x74e   : > { %1698 = vmatpush.msra.mxu2 %v2411_v40 }
 0x796   : > { %v1603_v41 = vpop.xlane.xlu1 %1602 }
 0x797   : > { %2460 = vrcp.f32 %v1603_v41 }
 0x79d   : > { %v2461_v43 = vpop.eup %2460 }
 0x7a5   : > { %v1625_v44 = vpop.f32.mrf.mxu2 }
 0x7a6   : > { %v1628_v45 = vmul.f32 %v2461_v43, %v1625_v44 }
 0x7a8   : > { %2287 = vmatmul.msk.f32.vlgmr.msra.gmra.mxu0 %vm1061_vm1, %v1628_v45 }
 0x7aa   : > { %v1658_v46 = vpop.f32.mrf.mxu1 }
 0x7ab   : > { %v1661_v47 = vmul.f32 0.35355338, %v1658_v46  ;;  %v1985_v46 = vld [vmem:[#allocation11 + $0x18] sm:$0xff] }
 0x7ad   : > { %v1662_v48 = vsel %vm1594_vm6, %v1661_v47, -inf }
 0x7ae   : > { %v1850_v49 = vpop.permute.xlu1 %1849  ;;  %1663 = vmax.xlane.f32.xlu2 %v1662_v48  ;;  %v1983_v48 = vld [vmem:[#allocation11 + $0x8] sm:$0xff] }
 0x7af   : > { %2294 = vmatpush.xpose.msk.msrb.mxu0 %vm1061_vm1, %v1850_v49  ;;  %v1982_v49 = vld [vmem:[#allocation11] sm:$0xff] }
 0x7b2   : > { %2295 = vmatmul.msk.f32.vlgmr.msrb.gmra.mxu0 %vm1061_vm1, %v1848_v37 }
 0x7b7   : > { %v1779_v50 = vpop.f32.mrf.mxu1 }
 0x7b8   : > { %v1782_v51 = vmul.f32 0.35355338, %v1779_v50  ;;  %v2028_v50 = vld [vmem:[%s3350_s20 + $0x70] sm:$0xff] }
 0x7ba   : > { %v1783_v52 = vsel %vm1594_vm6, %v1782_v51, -inf }
 0x7bb   : > { %1784 = vmax.xlane.f32.xlu1 %v1783_v52 }
 0x7c6   : > { %2413 = vrot.lane.b32.xlu2 %v2407_v28, %s2746_s3  ;;  %s3417_s3 = sld [smem:[#allocation37_spill]] }
 0x7d4   : > { %2418 = vrot.lane.b32.xlu1 %v2407_v28, %s2747_s10  ;;  %s3416_s10 = sld [smem:[#allocation39_spill]] }
 0x7da   : > { %v2433_v11 = vld [vmem:[%s3416_s10] ss:$0 sm:$0xff] }
 0x821   : > { %v1664_v53 = vpop.xlane.xlu2 %1663 }
 0x822   : > { %v1665_v54 = vsub.f32 %v1661_v47, %v1664_v53  ;;  %v1984_v47 = vld [vmem:[#allocation11 + $0x10] sm:$0xff] }
 0x824   : > { %v1666_v55 = vmul.f32 1.442695, %v1665_v54  ;;  %v2026_v54 = vld [vmem:[%s3350_s20 + $0x60] sm:$0xff] }
 0x825   : > { %v1747_v56 = vpop.f32.mrf.mxu0 }
 0x826   : > { %2462 = vpow2.f32 %v1666_v55 }
 0x829   : > { %v2414_v57 = vpop.permute.xlu2 %2413 }
 0x82a   : > { %v2415_v58 = vunpack.i.l.bf16 %v2414_v57  ;;  %v2416_v60 = vunpack.i.h.bf16 %v2414_v57  ;;  %v2024_v57 = vld [vmem:[%s3350_s20 + $0x50] sm:$0xff] }
 0x82c   : > { %v2463_v59 = vpop.eup %2462  ;;  %1816 = vmatpush.msrb.mxu2 %v2415_v58  ;;  %v2023_v58 = vld [vmem:[%s3350_s20 + $0x48] sm:$0xff] }
 0x82d   : > { %2285 = vmatmul.msk.f32.vlgmr.msra.gmra.mxu2 %vm1594_vm6, %v2463_v59  ;;  %v1668_v4 = vsel %vm1594_vm6, %v2463_v59, 0.0  ;;  %v2022_v59 = vld [vmem:[%s3350_s20 + $0x40] sm:$0xff] }
 0x82e   : > { %v1785_v61 = vpop.xlane.xlu1 %1784  ;;  %1817 = vmatpush.msrb.mxu2 %v2416_v60 }
 0x82f   : > { %v1786_v62 = vsub.f32 %v1782_v51, %v1785_v61  ;;  %v1876_v63 = vpop.f32.mrf.mxu0  ;;  %v2027_v51 = vld [vmem:[%s3350_s20 + $0x68] sm:$0xff]  ;;  %v2021_v61 = vld [vmem:[%s3350_s20 + $0x38] sm:$0xff] }
 0x830   : > { %v1879_v0 = vmul.f32 0.35355338, %v1876_v63  ;;  %1938 = vmatpush.msra.mxu2 %v1563_v26  ;;  %v2020_v63 = vld [vmem:[%s3350_s20 + $0x30] sm:$0xff] }
 0x831   : > { %v1787_v1 = vmul.f32 1.442695, %v1786_v62 }
 0x832   : > { %v1880_v2 = vsel %vm1594_vm6, %v1879_v0, -inf }
 0x833   : > { %2464 = vpow2.f32 %v1787_v1  ;;  %1881 = vmax.xlane.f32.xlu0 %v1880_v2  ;;  %v2019_v1 = vld [vmem:[%s3350_s20 + $0x28] sm:$0xff] }
 0x839   : > { %v2465_v3 = vpop.eup %2464 }
 0x83a   : > { %2291 = vmatmul.msk.f32.vlgmr.msrb.gmra.mxu2 %vm1594_vm6, %v2465_v3  ;;  %v1789_v5 = vsel %vm1594_vm6, %v2465_v3, 0.0  ;;  %v2018_v3 = vld [vmem:[%s3350_s20 + $0x20] sm:$0xff] }
 0x83b   : > { %1669 = vadd.xlane.f32.xlu0 %v1668_v4 }
 0x843   : > { %1790 = vadd.xlane.f32.xlu0 %v1789_v5  ;;  %v2017_v5 = vld [vmem:[%s3350_s20 + $0x18] sm:$0xff] }
 0x846   : > { %v2419_v6 = vpop.permute.xlu1 %2418 }
 0x847   : > { %v2420_v7 = vunpack.i.l.bf16 %v2419_v6  ;;  %v2421_v9 = vunpack.i.h.bf16 %v2419_v6 }
 0x849   : > { %1913 = vmatpush.msrb.mxu1 %v2420_v7  ;;  %v2432_v7 = vld [vmem:[%s3354_s24] ss:$0 sm:$0xff] }
 0x84b   : > { %1914 = vmatpush.msrb.mxu1 %v2421_v9 }
 0x8a6   : > { %v1882_v13 = vpop.xlane.xlu0 %1881 }
 0x8a7   : > { %v1883_v14 = vsub.f32 %v1879_v0, %v1882_v13 }
 0x8a9   : > { %v1884_v15 = vmul.f32 1.442695, %v1883_v14 }
 0x8ab   : > { %2466 = vpow2.f32 %v1884_v15  ;;  %v2016_v15 = vld [vmem:[%s3350_s20 + $0x10] sm:$0xff] }
 0x8ae   : > { %v1670_v16 = vpop.xlane.xlu0 %1669 }
 0x8af   : > { %2468 = vrcp.f32 %v1670_v16  ;;  %v2015_v16 = vld [vmem:[%s3350_s20 + $0x8] sm:$0xff] }
 0x8b0   : > { %v1700_v20 = vpop.f32.mrf.mxu2 }
 0x8b1   : > { %v2467_v17 = vpop.eup %2466 }
 0x8b2   : > { %2296 = vmatmul.msk.f32.vlgmr.msrb.gmra.mxu1 %vm1594_vm6, %v2467_v17  ;;  %v1886_v18 = vsel %vm1594_vm6, %v2467_v17, 0.0  ;;  %v2014_v17 = vld [vmem:[%s3350_s20] sm:$0xff] }
 0x8b3   : > { %1887 = vadd.xlane.f32.xlu2 %v1886_v18  ;;  %v2434_v18 = vld [vmem:[%s3417_s3] ss:$0 sm:$0xff]  ;;  %s3420_s3 = sld [smem:[#allocation42_spill]] }
 0x8b5   : > { %v2469_v19 = vpop.eup %2468 }
 0x8b6   : > { %v1703_v21 = vmul.f32 %v2469_v19, %v1700_v20  ;;  %v1791_v22 = vpop.xlane.xlu0 %1790 }
 0x8b7   : > { %2470 = vrcp.f32 %v1791_v22  ;;  %v2435_v22 = vld [vmem:[%s3418_s25] ss:$0 sm:$0xff] }
 0x8b8   : > { %2286 = vmatmul.msk.f32.vlgmr.msrb.gmra.mxu3 %vm1061_vm1, %v1703_v21 }
 0x8b9   : > { %2005 = vmatpush.msrb.mxu3 %v1985_v46  ;;  %s2099_s10 = scalar_lea.hbm %s3420_s3, %s2300_s16  ;;  %s2678_s12 = scalar_lea.hbm %s3420_s3, 16 }
 0x8ba   : > { %s2103_s14 = sshll.u32 %s2099_s10, 4  ;;  %s2104_s14 = int_to_ptr.hbm [resolvable:$true] %s2103_s14 }
 0x8bb   : > { %2006 = vmatpush.msrb.mxu3 %v1984_v47  ;;  %s2672_s27 = sshra.s32 %s2104_s14, 4  ;;  %s2673_s27 = int_to_ptr.hbm [resolvable:$true] %s2672_s27 }
 0x8bc   : > { %s2674_s16 = scalar_lea.hbm %s2673_s27, 8  ;;  %p2679_p8 = scmp.lt.s32.totalorder %s2673_s27, %s3420_s3 }
 0x8bd   : > { %v2471_v23 = vpop.eup %2470  ;;  %v1819_v24 = vpop.f32.mrf.mxu2  ;;  %2007 = vmatpush.msrb.mxu3 %v1983_v48  ;;  %p2675_p3 = scmp.ne.s32.totalorder %s2673_s27, %s2674_s16  ;;  %p2680_p7 = scmp.lt.s32.totalorder %s2678_s12, %s2674_s16 }
 0x8be   : > { %v1822_v25 = vmul.f32 %v2471_v23, %v1819_v24 }
 0x8bf   : > { %2008 = vmatpush.msrb.mxu3 %v1982_v49  ;;  %p2676_p5 = pnand %p2675_p3, %p2980_p13  ;;  %p2681_p9 = por %p2680_p7, %p2679_p8 }
 0x8c0   : > { %2292 = vmatmul.msk.f32.vlgmr.msra.gmra.mxu3 %vm1061_vm1, %v1822_v25 }
 0x8c1   : > { %p2677_p12 = pneg %p2676_p5 }
 0x8c3   : > { %p2682_p10 = pnand %p2681_p9, %p2677_p12 }
 0x926   : > { %v1888_v27 = vpop.xlane.xlu2 %1887 }
 0x927   : > { %2472 = vrcp.f32 %v1888_v27 }
 0x92d   : > { %v2473_v28 = vpop.eup %2472 }
 0x92f   : > { %v1916_v29 = vpop.f32.mrf.mxu1 }
 0x930   : > { %v1919_v30 = vmul.f32 %v2473_v28, %v1916_v29 }
 0x932   : > { %2297 = vmatmul.msk.f32.vlgmr.msra.gmra.mxu2 %vm1061_vm1, %v1919_v30 }
 0x93b   : > { %v1724_v31 = vpop.f32.mrf.mxu3 }
 0x93c   : > { %v1748_v33 = vadd.f32 %v1747_v56, %v1724_v31  ;;  %v2025_v56 = vld [vmem:[%s3350_s20 + $0x58] sm:$0xff] }
 0x943   : > { %v1843_v32 = vpop.f32.mrf.mxu3 }
 0x944   : > { %v1846_v34 = vadd.f32 %v1843_v32, %v1748_v33 }
 0x9b5   : > { %v1940_v36 = vpop.f32.mrf.mxu2 }
 0x9b6   : > { %v1943_v8 = vadd.f32 %v1940_v36, %v1846_v34 }
 0x9b8   : > { %v1948_v37 = vadd.f32 %v2431_v35, %v1943_v8 }
 0x9ba   : > { %v1949_v38 = vadd.f32 %v1948_v37, %v3168_v12  ;;  %v2029_v12 = vld [vmem:[%s3350_s20 + $0x78] sm:$0xff] }
 0x9bb   : > { %2034 = vmatpush.msra.mxu0 %v2029_v12 }
 0x9bc   : > { %v1950_v39 = vsel %vm977_vm0, %v1949_v38, 0.0 }
 0x9bd   : > { %1951 = vadd.xlane.f32.xlu1 %v1950_v39  ;;  %2035 = vmatpush.msra.mxu0 %v2028_v50 }
 0x9bf   : > { %2036 = vmatpush.msra.mxu0 %v2027_v51 }
 0x9c1   : > { %2037 = vmatpush.msra.mxu0 %v2026_v54 }
 0x9c3   : > { %2038 = vmatpush.msra.mxu0 %v2025_v56 }
 0x9c5   : > { %2039 = vmatpush.msra.mxu0 %v2024_v57 }
 0x9c7   : > { %2040 = vmatpush.msra.mxu0 %v2023_v58 }
 0x9c9   : > { %2041 = vmatpush.msra.mxu0 %v2022_v59 }
 0x9cb   : > { %2042 = vmatpush.msra.mxu0 %v2021_v61 }
 0x9cd   : > { %2043 = vmatpush.msra.mxu0 %v2020_v63 }
 0x9cf   : > { %2044 = vmatpush.msra.mxu0 %v2019_v1 }
 0x9d1   : > { %2045 = vmatpush.msra.mxu0 %v2018_v3 }
 0x9d3   : > { %2046 = vmatpush.msra.mxu0 %v2017_v5 }
 0x9d5   : > { %2047 = vmatpush.msra.mxu0 %v2016_v15 }
 0x9d7   : > { %2048 = vmatpush.msra.mxu0 %v2015_v16 }
 0x9d9   : > { %2049 = vmatpush.msra.mxu0 %v2014_v17 }
 0xa30   : > { %v1952_v40 = vpop.xlane.xlu1 %1951 }
 0xa31   : > { %v1953_v41 = vmul.f32 %v1952_v40, %v3143_v42  ;;  %v2436_v40 = vld [vmem:[%s3419_s0] ss:$0 sm:$0xff] }
 0xa33   : > { %v1954_v43 = vsub.f32 %v1949_v38, %v1953_v41 }
 0xa35   : > { %v1955_v44 = vmul.f32 %v1954_v43, %v1954_v43 }
 0xa37   : > { %v1956_v45 = vsel %vm977_vm0, %v1955_v44, 0.0 }
 0xa38   : > { %1957 = vadd.xlane.f32.xlu0 %v1956_v45 }
 0xaab   : > { %v1958_v52 = vpop.xlane.xlu0 %1957 }
 0xaac   : > { %v1959_v53 = vmul.f32 %v1958_v52, %v3143_v42 }
 0xaae   : > { %v1960_v55 = vadd.f32 1e-05, %v1959_v53 }
 0xab0   : > { %2474 = vrsqrt.f32 %v1960_v55  ;;  %vm1967_vm8 = vweird.f32 %v1960_v55 }
 0xab6   : > { %v2475_v60 = vpop.eup %2474 }
 0xab7   : > { %v1962_v62 = vmul.f32 %v2475_v60, %v1960_v55  ;;  %vm1968_vm7 = vweird.f32 %v2475_v60 }
 0xab8   : > { %vm1969_vm9 = vmor %vm1967_vm8, %vm1968_vm7 }
 0xab9   : > { %v1963_v0 = vmul.f32 %v2475_v60, %v1962_v62 }
 0xabb   : > { %v1964_v2 = vmul.f32 0.5, %v1963_v0 }
 0xabd   : > { %v1965_v4 = vsub.f32 1.5, %v1964_v2 }
 0xabf   : > { %v1966_v6 = vmul.f32 %v2475_v60, %v1965_v4 }
 0xac1   : > { %v1970_v9 = vsel %vm1969_vm9, %v2475_v60, %v1966_v6 }
 0xac2   : > { %v1971_v10 = vmul.f32 %v1970_v9, %v1954_v43  ;;  %v2437_v43 = vld [vmem:[%s3421_s1] ss:$0 sm:$0xff] }
 0xac4   : > { %v1976_v13 = vmul.f32 %v2432_v7, %v1971_v10 }
 0xac6   : > { %v1981_v14 = vadd.f32 %v2433_v11, %v1976_v13 }
 0xac8   : > { %2298 = vmatmul.msk.f32.vlgmr.msrb.gmra.mxu3 %vm977_vm0, %v1981_v14 }
 0xb4b   : > { %v2010_v19 = vpop.f32.mrf.mxu3 }
 0xb4c   : > { %v2011_v20 = vadd.f32 %v2434_v18, %v2010_v19 }
 0xb4e   : > { %v2013_v21 = vmax.f32 %v2011_v20, 0.0 }
 0xb50   : > { %2050 = vmatmul.f32.vlgmr.msra.gmra.mxu0 %v2013_v21 }
 0xbcd   : > { %v2051_v23 = vpop.f32.mrf.mxu0 }
 0xbce   : > { %v2052_v24 = vadd.f32 %v2435_v22, %v2051_v23 }
 0xbd0   : > { %v2054_v25 = vadd.f32 %v2052_v24, %v1981_v14 }
 0xbd2   : > { %v2055_v26 = vsel %vm977_vm0, %v2054_v25, 0.0 }
 0xbd3   : > { %2056 = vadd.xlane.f32.xlu0 %v2055_v26 }
 0xc46   : > { %v2057_v27 = vpop.xlane.xlu0 %2056 }
 0xc47   : > { %v2058_v28 = vmul.f32 %v2057_v27, %v3143_v42 }
 0xc49   : > { %v2059_v29 = vsub.f32 %v2054_v25, %v2058_v28 }
 0xc4b   : > { %v2060_v30 = vmul.f32 %v2059_v29, %v2059_v29 }
 0xc4d   : > { %v2061_v31 = vsel %vm977_vm0, %v2060_v30, 0.0 }
 0xc4e   : > { %2062 = vadd.xlane.f32.xlu0 %v2061_v31 }
 0xcc1   : > { %v2063_v32 = vpop.xlane.xlu0 %2062 }
 0xcc2   : > { %v2064_v33 = vmul.f32 %v2063_v32, %v3143_v42 }
 0xcc4   : > { %v2065_v34 = vadd.f32 1e-05, %v2064_v33 }
 0xcc6   : > { %2476 = vrsqrt.f32 %v2065_v34  ;;  %vm2072_vm11 = vweird.f32 %v2065_v34 }
 0xccc   : > { %v2477_v35 = vpop.eup %2476 }
 0xccd   : > { %v2067_v36 = vmul.f32 %v2477_v35, %v2065_v34  ;;  %vm2073_vm10 = vweird.f32 %v2477_v35 }
 0xcce   : > { %vm2074_vm12 = vmor %vm2072_vm11, %vm2073_vm10 }
 0xccf   : > { %v2068_v8 = vmul.f32 %v2477_v35, %v2067_v36 }
 0xcd1   : > { %v2069_v37 = vmul.f32 0.5, %v2068_v8 }
 0xcd3   : > { %v2070_v38 = vsub.f32 1.5, %v2069_v37 }
 0xcd5   : > { %v2071_v39 = vmul.f32 %v2477_v35, %v2070_v38 }
 0xcd7   : > { %v2075_v42 = vsel %vm2074_vm12, %v2477_v35, %v2071_v39 }
 0xcd8   : > { %v2076_v41 = vmul.f32 %v2075_v42, %v2059_v29 }
 0xcda   : > { %v2081_v44 = vmul.f32 %v2436_v40, %v2076_v41 }
 0xcdc   : > { %v2086_v45 = vadd.f32 %v2437_v43, %v2081_v44 }
 0xcde   : > { %2087 = vst.msk [vmem:[%s960_s4] sm:$0xff] %vm977_vm0, %v2086_v45 }
 0xcdf   : > { %2685 = shalt.err (!%p2682_p10)
}
 0xce0   : > { %2326 = dma.vmem_to_hbm [thread:$0]  (%p2980_p13), %s2102_s13, 128, %s2104_s14, %s2089_s29  }
 0xce1 PF: > { %s2115_s4 = sand.u32 1, %s2724_s8   ;;  %p3423_p11 = scmp.ge.s32.totalorder %s2736_s30, 2 }
 0xce2   : > { %s2116_s21 = scalar_lea.sflag [#allocation4], %s2115_s4 }
 0xce3   : > { %p2349_p0 = pnand %p3423_p11, %p2985_p4 }
 0xce5   : > { %p2350_p2 = pneg %p2349_p0 }
 0xce7   : > { %2719 = dma.done.wait (%p2350_p2), %s2116_s21, 128  }
 0xce8   : > { %2721 = vsyncadd (%p2350_p2), %s2116_s21, 4294967168  ;;  %s3424_s7 = sld [smem:[#allocation19_spill]]  ;;  %p44_p6 = scmp.ge.s32.totalorder %s2960_s2, 4  }
 0xce9   : > { %s3425_s8 = smov %s2728_s5  ;;  %s3426_s5 = smov %s2732_s9 }
 0xcea   : > { %s3428_s30 = smov %s2960_s2  ;;  %46 = sbr.rel (!%p44_p6) target bundleno = 32 (0x20), region = 200 }
 0xcee   : > { %s3427_s9 = smov %s3424_s7 }
 0xcef   :  { %2122 = vsyncpa [#allocation3], 1 }
 0xcf0   :  { %2124 = vsyncpa [#allocation3 + $0x1], 1 }
 0xcf1   :  { %2125 = vsyncpa [#allocation6], 1 }
 0xcf2   :  { %2126 = vsyncpa [#allocation9], 1 }
 0xcf3   :  { %2127 = vsyncpa [#allocation12], 1 }
 0xcf4   :  { %2128 = vsyncpa [#allocation4], 1 }
 0xcf5   :  { %2130 = vsyncpa [#allocation4 + $0x1], 1 }

</bundles_post_ra>
